<compile_context>
chip_gen: v7x
topology: tpu7x:2x2x1
jax: 0.10.0
libtpu: 0.0.40
codegen_flags: <defaults>
</compile_context>

<pallas_src>
import functools

import jax
import jax.numpy as jnp
from jax import lax
from jax.experimental import pallas as pl
from jax.experimental.pallas import tpu as pltpu

EPS = 1e-5          # nn.BatchNorm1d default eps
SLOPE = 0.01        # F.leaky_relu default negative_slope

C1, K1 = 20, 3      # Conv1d(1, 20, kernel_size=3)
C2, K2 = 40, 2      # Conv1d(20, 40, kernel_size=2)
HID = 180           # fc1 output features
HID_PAD = 256       # lane-friendly padded hidden width
LANE = 128


def _pad_to(n, m):
    return ((n + m - 1) // m) * m


def _leaky(x):
    return jnp.where(x >= 0, x, SLOPE * x)


# ----------------------------------------------------------------------------
# Fused kernel: conv1 -> bn1 -> lrelu -> conv2 -> bn2 -> lrelu -> fc1 -> fc2
# Everything 2-D, lane-dense (widths padded to 128 multiples), in VMEM.
# ----------------------------------------------------------------------------
def cnn_e_kernel(b_real, l1, l2, c1, c2,
                 x_ref, w1b_ref, rows_ref, g1m_ref, g1t_ref,
                 w2b_ref, g2m_ref, g2t_ref, wf1_ref, wf2_ref, o_ref):
    bp = x_ref.shape[0]
    w1p = w1b_ref.shape[1]          # padded C1*L1 (384)
    w2p = w2b_ref.shape[1]          # padded C2*L2 (640)
    hid = wf1_ref.shape[1]          # padded fc1 width (256)
    apad = o_ref.shape[1]           # padded num_action (128)

    def dotf(a, b):
        return jnp.dot(a, b, preferred_element_type=jnp.float32)

    # ---- unpack the single packed row buffer (static, 128-aligned slices) ---
    off = 0
    b1c = rows_ref[:, off:off + w1p]; off += w1p          # conv1 bias, broadcast
    be1c = rows_ref[:, off:off + w1p]; off += w1p         # bn1 beta, broadcast
    g1 = rows_ref[:, off:off + c1]; off += LANE           # bn1 gamma, per-channel
    b2c = rows_ref[:, off:off + w2p]; off += w2p          # conv2 bias, broadcast
    be2c = rows_ref[:, off:off + w2p]; off += w2p         # bn2 beta, broadcast
    g2 = rows_ref[:, off:off + c2]; off += LANE           # bn2 gamma, per-channel
    bf1 = rows_ref[:, off:off + hid]; off += hid          # fc1 bias (padded)
    bf2 = rows_ref[:, off:off + apad]                     # fc2 bias (padded)

    # 0/1 indicator gather / scatter matrices stored bf16 (exact) -> f32 stats
    g1m = g1m_ref[...].astype(jnp.float32)
    g1t = g1t_ref[...].astype(jnp.float32)
    g2m = g2m_ref[...].astype(jnp.float32)
    g2t = g2t_ref[...].astype(jnp.float32)

    # BN batch statistics must only see the real (un-padded) rows
    if b_real == bp:
        def msum(t):
            return jnp.sum(t, axis=0, keepdims=True)
    else:
        rmask = (lax.broadcasted_iota(jnp.int32, (bp, 1), 0)
                 < b_real).astype(jnp.float32)

        def msum(t):
            return jnp.sum(t * rmask, axis=0, keepdims=True)

    # ---- conv1 as one lane-dense Toeplitz matmul ----------------------------
    h1 = dotf(x_ref[...], w1b_ref[...]) + b1c             # (Bp, 384)

    # ---- bn1: training-mode batch stats, two-pass variance ------------------
    inv_n1 = 1.0 / float(b_real * l1)
    m1 = dotf(msum(h1), g1m) * inv_n1                     # (1, C1) per-channel mean
    d1 = h1 - dotf(m1, g1t)                               # (Bp, 384)
    v1 = dotf(msum(d1 * d1), g1m) * inv_n1                # (1, C1) per-channel var
    sc1 = lax.rsqrt(v1 + EPS) * g1                        # (1, C1)
    a1 = _leaky(d1 * dotf(sc1, g1t) + be1c)               # (Bp, 384)

    # ---- conv2: both taps folded into one bf16 matmul -----------------------
    h2 = dotf(a1.astype(jnp.bfloat16), w2b_ref[...]) + b2c    # (Bp, 640)

    # ---- bn2 -----------------------------------------------------------------
    inv_n2 = 1.0 / float(b_real * l2)
    m2 = dotf(msum(h2), g2m) * inv_n2
    d2 = h2 - dotf(m2, g2t)
    v2 = dotf(msum(d2 * d2), g2m) * inv_n2
    sc2 = lax.rsqrt(v2 + EPS) * g2
    a2 = _leaky(d2 * dotf(sc2, g2t) + be2c)               # (Bp, 640), PyTorch flat order

    # ---- fc1 -> lrelu -> fc2 -> lrelu ----------------------------------------
    y1 = _leaky(dotf(a2.astype(jnp.bfloat16), wf1_ref[...]) + bf1)   # (Bp, 256)
    o_ref[...] = _leaky(dotf(y1, wf2_ref[...]) + bf2)                # (Bp, 128)


_VMEM = pl.BlockSpec(memory_space=pltpu.MemorySpace.VMEM)


@functools.partial(jax.jit, static_argnames=("input_length", "num_action"))
def cnn_e_forward(x, packed, *, input_length, num_action):
    B = x.shape[0]
    Bp = max(8, _pad_to(B, 8))                      # f32 sublane multiple
    x2d = x.reshape(B, input_length).astype(jnp.float32)
    if Bp != B:
        x2d = jnp.pad(x2d, ((0, Bp - B), (0, 0)))   # zero pad rows (masked in BN)

    L1 = input_length - K1 + 1
    L2 = L1 - K2 + 1
    W1P = packed["w1big"].shape[1]
    W2P = packed["w2big"].shape[1]
    HP = packed["wf1"].shape[1]
    AP = packed["wf2"].shape[1]

    args = (x2d, packed["w1big"], packed["rows"],
            packed["g1m"], packed["g1t"], packed["w2big"],
            packed["g2m"], packed["g2t"], packed["wf1"], packed["wf2"])

    flops = 2 * Bp * (input_length * W1P + W1P * W2P + W2P * HP + HP * AP)
    flops += 8 * (W1P * C1 + W2P * C2) + 4 * Bp * (W1P + W2P)   # BN stat matmuls (approx)
    bytes_accessed = sum(a.size * a.dtype.itemsize for a in args) + Bp * AP * 4

    kern = functools.partial(cnn_e_kernel, B, L1, L2, C1, C2)
    out = pl.pallas_call(
        kern,
        out_shape=jax.ShapeDtypeStruct((Bp, AP), jnp.float32),
        in_specs=[_VMEM] * len(args),
        out_specs=_VMEM,
        compiler_params=pltpu.CompilerParams(vmem_limit_bytes=32 * 1024 * 1024),
        cost_estimate=pl.CostEstimate(flops=int(flops),
                                      transcendentals=int(C1 + C2),
                                      bytes_accessed=int(bytes_accessed)),
    )(*args)
    return out[:B, :num_action]


# ----------------------------------------------------------------------------
# One-time weight packing (wrapper-side, not in the kernel)
# ----------------------------------------------------------------------------
def pack_params(p, input_length, num_action):
    L = input_length
    L1 = L - K1 + 1
    L2 = L1 - K2 + 1
    W1 = C1 * L1
    W2 = C2 * L2
    W1P = _pad_to(W1, LANE)                   # 280 -> 384
    W2P = _pad_to(W2, LANE)                   # 520 -> 640
    AP = max(_pad_to(num_action, LANE), LANE)  # 4 -> 128

    f32, bf16 = jnp.float32, jnp.bfloat16

    # conv1 Toeplitz:  W1big[i, c*L1 + l] = w1[c, i - l]  if 0 <= i-l < K1
    i = jnp.arange(L)[:, None, None]
    c = jnp.arange(C1)[None, :, None]
    l = jnp.arange(L1)[None, None, :]
    k = i - l
    w1big = jnp.where((k >= 0) & (k < K1),
                      p["w1"][c, jnp.clip(k, 0, K1 - 1)], 0.0)
    w1big = w1big.reshape(L, W1).astype(f32)
    w1big = jnp.pad(w1big, ((0, 0), (0, W1P - W1)))

    # conv2 Toeplitz (both taps folded):
    # W2big[c*L1 + l', o*L2 + l] = w2[o, c, l' - l]  if 0 <= l'-l < K2
    cp = jnp.arange(C1)[:, None, None, None]
    lp = jnp.arange(L1)[None, :, None, None]
    oo = jnp.arange(C2)[None, None, :, None]
    ll = jnp.arange(L2)[None, None, None, :]
    kk = lp - ll
    w2big = jnp.where((kk >= 0) & (kk < K2),
                      p["w2"][oo, cp, jnp.clip(kk, 0, K2 - 1)], 0.0)
    w2big = w2big.reshape(W1, W2).astype(f32)
    w2big = jnp.pad(w2big, ((0, W1P - W1), (0, W2P - W2))).astype(bf16)

    # 0/1 per-channel gather / scatter matrices (exact in bf16)
    g1mat = jnp.repeat(jnp.eye(C1, dtype=f32), L1, axis=0)       # (W1, C1)
    g1mat = jnp.pad(g1mat, ((0, W1P - W1), (0, 0)))
    g2mat = jnp.repeat(jnp.eye(C2, dtype=f32), L2, axis=0)       # (W2, C2)
    g2mat = jnp.pad(g2mat, ((0, W2P - W2), (0, 0)))

    # pre-broadcast biases / BN betas / gammas, packed into ONE row buffer
    def row(v, n, npad):
        return jnp.pad(v.reshape(1, n).astype(f32), ((0, 0), (0, npad - n)))

    rows = jnp.concatenate([
        row(jnp.repeat(p["b1"], L1), W1, W1P),        # conv1 bias broadcast
        row(jnp.repeat(p["be1"], L1), W1, W1P),       # bn1 beta broadcast
        row(p["g1"], C1, LANE),                       # bn1 gamma per-channel
        row(jnp.repeat(p["b2"], L2), W2, W2P),        # conv2 bias broadcast
        row(jnp.repeat(p["be2"], L2), W2, W2P),       # bn2 beta broadcast
        row(p["g2"], C2, LANE),                       # bn2 gamma per-channel
        row(p["bf1"], HID, HID_PAD),                  # fc1 bias (padded)
        row(p["bf2"], num_action, AP),                # fc2 bias (padded)
    ], axis=1)

    # lane-padded FC weights; fc1 in bf16 (big), fc2 in f32 (tiny, last layer)
    wf1 = jnp.zeros((W2P, HID_PAD), f32).at[:W2, :HID].set(p["wf1"]).astype(bf16)
    wf2 = jnp.zeros((HID_PAD, AP), f32).at[:HID, :num_action].set(p["wf2"])

    return dict(
        w1big=w1big, rows=rows,
        g1m=g1mat.astype(bf16), g1t=g1mat.T.astype(bf16),
        g2m=g2mat.astype(bf16), g2t=g2mat.T.astype(bf16),
        w2big=w2big, wf1=wf1, wf2=wf2,
    )


# ----------------------------------------------------------------------------
# Deterministic parameter init (PyTorch-like uniform(-1/sqrt(fan_in), +))
# ----------------------------------------------------------------------------
def init_params(key, input_length, num_action):
    L2 = input_length - 3
    fc_in = C2 * L2

    def u(k, shape, fan_in):
        bound = 1.0 / jnp.sqrt(fan_in)
        return jax.random.uniform(k, shape, jnp.float32, -bound, bound)

    ks = jax.random.split(key, 8)
    return dict(
        w1=u(ks[0], (C1, K1), 3.0),                 # Conv1d(1, 20, 3)
        b1=u(ks[1], (C1,), 3.0),
        w2=u(ks[2], (C2, C1, K2), float(C1 * K2)),  # Conv1d(20, 40, 2)
        b2=u(ks[3], (C2,), float(C1 * K2)),
        g1=jnp.ones((C1,), jnp.float32),            # BN1 weight
        be1=jnp.zeros((C1,), jnp.float32),          # BN1 bias
        g2=jnp.ones((C2,), jnp.float32),
        be2=jnp.zeros((C2,), jnp.float32),
        wf1=u(ks[4], (fc_in, HID), float(fc_in)),   # Linear(fc_in, 180), stored W.T
        bf1=u(ks[5], (HID,), float(fc_in)),
        wf2=u(ks[6], (HID, num_action), float(HID)),
        bf2=u(ks[7], (num_action,), float(HID)),
    )


# ----------------------------------------------------------------------------
# Pure-JAX f32 reference of the PyTorch forward (training-mode batch norm)
# ----------------------------------------------------------------------------
def reference(x, p, input_length, num_action):
    B = x.shape[0]
    L = input_length
    L1, L2 = L - 2, L - 3
    x = x.reshape(B, L).astype(jnp.float32)
    w1 = p["w1"]
    h1 = (w1[None, :, 0:1] * x[:, None, 0:L1]
          + w1[None, :, 1:2] * x[:, None, 1:L1 + 1]
          + w1[None, :, 2:3] * x[:, None, 2:L1 + 2]) + p["b1"][None, :, None]
    m = h1.mean((0, 2), keepdims=True)
    v = ((h1 - m) ** 2).mean((0, 2), keepdims=True)
    a1 = _leaky((h1 - m) / jnp.sqrt(v + EPS) * p["g1"][None, :, None]
                + p["be1"][None, :, None])
    w2 = p["w2"]
    h2 = (jnp.einsum("oi,bil->bol", w2[:, :, 0], a1[:, :, 0:L2])
          + jnp.einsum("oi,bil->bol", w2[:, :, 1], a1[:, :, 1:L2 + 1])
          + p["b2"][None, :, None])
    m2 = h2.mean((0, 2), keepdims=True)
    v2 = ((h2 - m2) ** 2).mean((0, 2), keepdims=True)
    a2 = _leaky((h2 - m2) / jnp.sqrt(v2 + EPS) * p["g2"][None, :, None]
                + p["be2"][None, :, None])
    flat = a2.reshape(B, -1)
    y1 = _leaky(flat @ p["wf1"] + p["bf1"])
    y2 = _leaky(y1 @ p["wf2"] + p["bf2"])
    return y2


if __name__ == "__main__":
    INPUT_LENGTH = 16
    NUM_ACTION = 4
    BATCH = 2

    key = jax.random.PRNGKey(0)
    k_par, k_x = jax.random.split(key)
    params = init_params(k_par, INPUT_LENGTH, NUM_ACTION)
    packed = pack_params(params, INPUT_LENGTH, NUM_ACTION)
    x = jax.random.normal(k_x, (BATCH, 1, INPUT_LENGTH), jnp.float32)

    out = cnn_e_forward(x, packed,
                        input_length=INPUT_LENGTH, num_action=NUM_ACTION)
    out = jax.block_until_ready(out)

    ref = reference(x, params, INPUT_LENGTH, NUM_ACTION)
    assert out.shape == (BATCH, NUM_ACTION), out.shape
    # bf16 storage of the two big weights (per perf feedback) gives <~1%
    # deviation from the pure-f32 reference; BN / elementwise math stays f32.
    assert jnp.allclose(out, ref, atol=3e-2, rtol=3e-2), (out, ref)

    # TODO(synk): BatchNorm running_mean/running_var momentum updates are a
    # training-time buffer side effect; they do not affect this forward output.
    print("KERNEL_OK")
</pallas_src>

<mosaic_0001>
module attributes {stable_mosaic.version = 11 : i64} {
  func.func @cnn_e_kernel(%arg0: memref<8x16xf32, #tpu.memory_space<vmem>>, %arg1: memref<16x384xf32, #tpu.memory_space<vmem>>, %arg2: memref<1x2688xf32, #tpu.memory_space<vmem>>, %arg3: memref<384x20xbf16, #tpu.memory_space<vmem>>, %arg4: memref<20x384xbf16, #tpu.memory_space<vmem>>, %arg5: memref<384x640xbf16, #tpu.memory_space<vmem>>, %arg6: memref<640x40xbf16, #tpu.memory_space<vmem>>, %arg7: memref<40x640xbf16, #tpu.memory_space<vmem>>, %arg8: memref<640x256xbf16, #tpu.memory_space<vmem>>, %arg9: memref<256x128xf32, #tpu.memory_space<vmem>>, %arg10: memref<8x128xf32, #tpu.memory_space<vmem>>) attributes {dimension_semantics = [], scalar_prefetch = 0 : i64, scratch_operands = 0 : i64, tpu.core_type = #tpu.core_type<tc>} {
    %c0 = arith.constant 0 : index
    %c0_0 = arith.constant 0 : index
    %0 = vector.load %arg2[%c0, %c0_0] : memref<1x2688xf32, #tpu.memory_space<vmem>>, vector<1x384xf32>
    %c0_1 = arith.constant 0 : index
    %c384 = arith.constant 384 : index
    %1 = vector.load %arg2[%c0_1, %c384] : memref<1x2688xf32, #tpu.memory_space<vmem>>, vector<1x384xf32>
    %c0_2 = arith.constant 0 : index
    %c768 = arith.constant 768 : index
    %2 = vector.load %arg2[%c0_2, %c768] : memref<1x2688xf32, #tpu.memory_space<vmem>>, vector<1x20xf32>
    %c0_3 = arith.constant 0 : index
    %c896 = arith.constant 896 : index
    %3 = vector.load %arg2[%c0_3, %c896] : memref<1x2688xf32, #tpu.memory_space<vmem>>, vector<1x640xf32>
    %c0_4 = arith.constant 0 : index
    %c1536 = arith.constant 1536 : index
    %4 = vector.load %arg2[%c0_4, %c1536] : memref<1x2688xf32, #tpu.memory_space<vmem>>, vector<1x640xf32>
    %c0_5 = arith.constant 0 : index
    %c2176 = arith.constant 2176 : index
    %5 = vector.load %arg2[%c0_5, %c2176] : memref<1x2688xf32, #tpu.memory_space<vmem>>, vector<1x40xf32>
    %c0_6 = arith.constant 0 : index
    %c2304 = arith.constant 2304 : index
    %6 = vector.load %arg2[%c0_6, %c2304] : memref<1x2688xf32, #tpu.memory_space<vmem>>, vector<1x256xf32>
    %c0_7 = arith.constant 0 : index
    %c2560 = arith.constant 2560 : index
    %7 = vector.load %arg2[%c0_7, %c2560] : memref<1x2688xf32, #tpu.memory_space<vmem>>, vector<1x128xf32>
    %c0_8 = arith.constant 0 : index
    %c0_9 = arith.constant 0 : index
    %8 = vector.load %arg3[%c0_8, %c0_9] : memref<384x20xbf16, #tpu.memory_space<vmem>>, vector<384x20xbf16>
    %9 = arith.extf %8 : vector<384x20xbf16> to vector<384x20xf32>
    %c0_10 = arith.constant 0 : index
    %c0_11 = arith.constant 0 : index
    %10 = vector.load %arg4[%c0_10, %c0_11] : memref<20x384xbf16, #tpu.memory_space<vmem>>, vector<20x384xbf16>
    %11 = arith.extf %10 : vector<20x384xbf16> to vector<20x384xf32>
    %c0_12 = arith.constant 0 : index
    %c0_13 = arith.constant 0 : index
    %12 = vector.load %arg6[%c0_12, %c0_13] : memref<640x40xbf16, #tpu.memory_space<vmem>>, vector<640x40xbf16>
    %13 = arith.extf %12 : vector<640x40xbf16> to vector<640x40xf32>
    %c0_14 = arith.constant 0 : index
    %c0_15 = arith.constant 0 : index
    %14 = vector.load %arg7[%c0_14, %c0_15] : memref<40x640xbf16, #tpu.memory_space<vmem>>, vector<40x640xbf16>
    %15 = arith.extf %14 : vector<40x640xbf16> to vector<40x640xf32>
    %16 = tpu.iota {dimensions = array<i32: 0>} : vector<8x1xi32>
    %c2_i32 = arith.constant 2 : i32
    %17 = vector.broadcast %c2_i32 : i32 to vector<8x1xi32>
    %18 = arith.cmpi slt, %16, %17 : vector<8x1xi32>
    %19 = arith.extui %18 : vector<8x1xi1> to vector<8x1xi32>
    %20 = arith.sitofp %19 : vector<8x1xi32> to vector<8x1xf32>
    %c0_16 = arith.constant 0 : index
    %c0_17 = arith.constant 0 : index
    %21 = vector.load %arg0[%c0_16, %c0_17] : memref<8x16xf32, #tpu.memory_space<vmem>>, vector<8x16xf32>
    %c0_18 = arith.constant 0 : index
    %c0_19 = arith.constant 0 : index
    %22 = vector.load %arg1[%c0_18, %c0_19] : memref<16x384xf32, #tpu.memory_space<vmem>>, vector<16x384xf32>
    %cst = arith.constant dense<0.000000e+00> : vector<8x384xf32>
    %23 = tpu.matmul %21, %22, %cst {dimension_numbers = #tpu.dot_dimension_numbers<[1], [0], [0], [1], [0, 0, 1, 1], [], []>} : vector<8x16xf32>, vector<16x384xf32>, vector<8x384xf32> -> vector<8x384xf32>
    %24 = vector.broadcast %0 : vector<1x384xf32> to vector<8x384xf32>
    %25 = arith.addf %23, %24 : vector<8x384xf32>
    %26 = vector.broadcast %20 : vector<8x1xf32> to vector<8x384xf32>
    %27 = arith.mulf %25, %26 : vector<8x384xf32>
    %cst_20 = arith.constant dense<0.000000e+00> : vector<384xf32>
    %28 = vector.multi_reduction <add>, %27, %cst_20 [0] : vector<8x384xf32> to vector<384xf32>
    %29 = vector.shape_cast %28 : vector<384xf32> to vector<1x384xf32>
    %cst_21 = arith.constant dense<0.000000e+00> : vector<1x20xf32>
    %30 = tpu.matmul %29, %9, %cst_21 {dimension_numbers = #tpu.dot_dimension_numbers<[1], [0], [0], [1], [0, 0, 1, 1], [], []>} : vector<1x384xf32>, vector<384x20xf32>, vector<1x20xf32> -> vector<1x20xf32>
    %cst_22 = arith.constant 0.0357142873 : f32
    %31 = vector.broadcast %cst_22 : f32 to vector<1x20xf32>
    %32 = arith.mulf %30, %31 : vector<1x20xf32>
    %cst_23 = arith.constant dense<0.000000e+00> : vector<1x384xf32>
    %33 = tpu.matmul %32, %11, %cst_23 {dimension_numbers = #tpu.dot_dimension_numbers<[1], [0], [0], [1], [0, 0, 1, 1], [], []>} : vector<1x20xf32>, vector<20x384xf32>, vector<1x384xf32> -> vector<1x384xf32>
    %34 = vector.broadcast %33 : vector<1x384xf32> to vector<8x384xf32>
    %35 = arith.subf %25, %34 : vector<8x384xf32>
    %36 = arith.mulf %35, %35 : vector<8x384xf32>
    %37 = vector.broadcast %20 : vector<8x1xf32> to vector<8x384xf32>
    %38 = arith.mulf %36, %37 : vector<8x384xf32>
    %cst_24 = arith.constant dense<0.000000e+00> : vector<384xf32>
    %39 = vector.multi_reduction <add>, %38, %cst_24 [0] : vector<8x384xf32> to vector<384xf32>
    %40 = vector.shape_cast %39 : vector<384xf32> to vector<1x384xf32>
    %cst_25 = arith.constant dense<0.000000e+00> : vector<1x20xf32>
    %41 = tpu.matmul %40, %9, %cst_25 {dimension_numbers = #tpu.dot_dimension_numbers<[1], [0], [0], [1], [0, 0, 1, 1], [], []>} : vector<1x384xf32>, vector<384x20xf32>, vector<1x20xf32> -> vector<1x20xf32>
    %cst_26 = arith.constant 0.0357142873 : f32
    %42 = vector.broadcast %cst_26 : f32 to vector<1x20xf32>
    %43 = arith.mulf %41, %42 : vector<1x20xf32>
    %cst_27 = arith.constant 9.99999974E-6 : f32
    %44 = vector.broadcast %cst_27 : f32 to vector<1x20xf32>
    %45 = arith.addf %43, %44 : vector<1x20xf32>
    %46 = math.rsqrt %45 : vector<1x20xf32>
    %47 = arith.mulf %46, %2 : vector<1x20xf32>
    %cst_28 = arith.constant dense<0.000000e+00> : vector<1x384xf32>
    %48 = tpu.matmul %47, %11, %cst_28 {dimension_numbers = #tpu.dot_dimension_numbers<[1], [0], [0], [1], [0, 0, 1, 1], [], []>} : vector<1x20xf32>, vector<20x384xf32>, vector<1x384xf32> -> vector<1x384xf32>
    %49 = vector.broadcast %48 : vector<1x384xf32> to vector<8x384xf32>
    %50 = arith.mulf %35, %49 : vector<8x384xf32>
    %51 = vector.broadcast %1 : vector<1x384xf32> to vector<8x384xf32>
    %52 = arith.addf %50, %51 : vector<8x384xf32>
    %cst_29 = arith.constant 0.000000e+00 : f32
    %53 = vector.broadcast %cst_29 : f32 to vector<8x384xf32>
    %54 = arith.cmpf oge, %52, %53 : vector<8x384xf32>
    %cst_30 = arith.constant 0.00999999977 : f32
    %55 = vector.broadcast %cst_30 : f32 to vector<8x384xf32>
    %56 = arith.mulf %55, %52 : vector<8x384xf32>
    %57 = arith.select %54, %52, %56 : vector<8x384xi1>, vector<8x384xf32>
    %58 = arith.truncf %57 : vector<8x384xf32> to vector<8x384xbf16>
    %c0_31 = arith.constant 0 : index
    %c0_32 = arith.constant 0 : index
    %59 = vector.load %arg5[%c0_31, %c0_32] : memref<384x640xbf16, #tpu.memory_space<vmem>>, vector<384x640xbf16>
    %cst_33 = arith.constant dense<0.000000e+00> : vector<8x640xf32>
    %60 = tpu.matmul %58, %59, %cst_33 {dimension_numbers = #tpu.dot_dimension_numbers<[1], [0], [0], [1], [0, 0, 1, 1], [], []>} : vector<8x384xbf16>, vector<384x640xbf16>, vector<8x640xf32> -> vector<8x640xf32>
    %61 = vector.broadcast %3 : vector<1x640xf32> to vector<8x640xf32>
    %62 = arith.addf %60, %61 : vector<8x640xf32>
    %63 = vector.broadcast %20 : vector<8x1xf32> to vector<8x640xf32>
    %64 = arith.mulf %62, %63 : vector<8x640xf32>
    %cst_34 = arith.constant dense<0.000000e+00> : vector<640xf32>
    %65 = vector.multi_reduction <add>, %64, %cst_34 [0] : vector<8x640xf32> to vector<640xf32>
    %66 = vector.shape_cast %65 : vector<640xf32> to vector<1x640xf32>
    %cst_35 = arith.constant dense<0.000000e+00> : vector<1x40xf32>
    %67 = tpu.matmul %66, %13, %cst_35 {dimension_numbers = #tpu.dot_dimension_numbers<[1], [0], [0], [1], [0, 0, 1, 1], [], []>} : vector<1x640xf32>, vector<640x40xf32>, vector<1x40xf32> -> vector<1x40xf32>
    %cst_36 = arith.constant 0.0384615399 : f32
    %68 = vector.broadcast %cst_36 : f32 to vector<1x40xf32>
    %69 = arith.mulf %67, %68 : vector<1x40xf32>
    %cst_37 = arith.constant dense<0.000000e+00> : vector<1x640xf32>
    %70 = tpu.matmul %69, %15, %cst_37 {dimension_numbers = #tpu.dot_dimension_numbers<[1], [0], [0], [1], [0, 0, 1, 1], [], []>} : vector<1x40xf32>, vector<40x640xf32>, vector<1x640xf32> -> vector<1x640xf32>
    %71 = vector.broadcast %70 : vector<1x640xf32> to vector<8x640xf32>
    %72 = arith.subf %62, %71 : vector<8x640xf32>
    %73 = arith.mulf %72, %72 : vector<8x640xf32>
    %74 = vector.broadcast %20 : vector<8x1xf32> to vector<8x640xf32>
    %75 = arith.mulf %73, %74 : vector<8x640xf32>
    %cst_38 = arith.constant dense<0.000000e+00> : vector<640xf32>
    %76 = vector.multi_reduction <add>, %75, %cst_38 [0] : vector<8x640xf32> to vector<640xf32>
    %77 = vector.shape_cast %76 : vector<640xf32> to vector<1x640xf32>
    %cst_39 = arith.constant dense<0.000000e+00> : vector<1x40xf32>
    %78 = tpu.matmul %77, %13, %cst_39 {dimension_numbers = #tpu.dot_dimension_numbers<[1], [0], [0], [1], [0, 0, 1, 1], [], []>} : vector<1x640xf32>, vector<640x40xf32>, vector<1x40xf32> -> vector<1x40xf32>
    %cst_40 = arith.constant 0.0384615399 : f32
    %79 = vector.broadcast %cst_40 : f32 to vector<1x40xf32>
    %80 = arith.mulf %78, %79 : vector<1x40xf32>
    %cst_41 = arith.constant 9.99999974E-6 : f32
    %81 = vector.broadcast %cst_41 : f32 to vector<1x40xf32>
    %82 = arith.addf %80, %81 : vector<1x40xf32>
    %83 = math.rsqrt %82 : vector<1x40xf32>
    %84 = arith.mulf %83, %5 : vector<1x40xf32>
    %cst_42 = arith.constant dense<0.000000e+00> : vector<1x640xf32>
    %85 = tpu.matmul %84, %15, %cst_42 {dimension_numbers = #tpu.dot_dimension_numbers<[1], [0], [0], [1], [0, 0, 1, 1], [], []>} : vector<1x40xf32>, vector<40x640xf32>, vector<1x640xf32> -> vector<1x640xf32>
    %86 = vector.broadcast %85 : vector<1x640xf32> to vector<8x640xf32>
    %87 = arith.mulf %72, %86 : vector<8x640xf32>
    %88 = vector.broadcast %4 : vector<1x640xf32> to vector<8x640xf32>
    %89 = arith.addf %87, %88 : vector<8x640xf32>
    %cst_43 = arith.constant 0.000000e+00 : f32
    %90 = vector.broadcast %cst_43 : f32 to vector<8x640xf32>
    %91 = arith.cmpf oge, %89, %90 : vector<8x640xf32>
    %cst_44 = arith.constant 0.00999999977 : f32
    %92 = vector.broadcast %cst_44 : f32 to vector<8x640xf32>
    %93 = arith.mulf %92, %89 : vector<8x640xf32>
    %94 = arith.select %91, %89, %93 : vector<8x640xi1>, vector<8x640xf32>
    %95 = arith.truncf %94 : vector<8x640xf32> to vector<8x640xbf16>
    %c0_45 = arith.constant 0 : index
    %c0_46 = arith.constant 0 : index
    %96 = vector.load %arg8[%c0_45, %c0_46] : memref<640x256xbf16, #tpu.memory_space<vmem>>, vector<640x256xbf16>
    %cst_47 = arith.constant dense<0.000000e+00> : vector<8x256xf32>
    %97 = tpu.matmul %95, %96, %cst_47 {dimension_numbers = #tpu.dot_dimension_numbers<[1], [0], [0], [1], [0, 0, 1, 1], [], []>} : vector<8x640xbf16>, vector<640x256xbf16>, vector<8x256xf32> -> vector<8x256xf32>
    %98 = vector.broadcast %6 : vector<1x256xf32> to vector<8x256xf32>
    %99 = arith.addf %97, %98 : vector<8x256xf32>
    %cst_48 = arith.constant 0.000000e+00 : f32
    %100 = vector.broadcast %cst_48 : f32 to vector<8x256xf32>
    %101 = arith.cmpf oge, %99, %100 : vector<8x256xf32>
    %cst_49 = arith.constant 0.00999999977 : f32
    %102 = vector.broadcast %cst_49 : f32 to vector<8x256xf32>
    %103 = arith.mulf %102, %99 : vector<8x256xf32>
    %104 = arith.select %101, %99, %103 : vector<8x256xi1>, vector<8x256xf32>
    %c0_50 = arith.constant 0 : index
    %c0_51 = arith.constant 0 : index
    %105 = vector.load %arg9[%c0_50, %c0_51] : memref<256x128xf32, #tpu.memory_space<vmem>>, vector<256x128xf32>
    %cst_52 = arith.constant dense<0.000000e+00> : vector<8x128xf32>
    %106 = tpu.matmul %104, %105, %cst_52 {dimension_numbers = #tpu.dot_dimension_numbers<[1], [0], [0], [1], [0, 0, 1, 1], [], []>} : vector<8x256xf32>, vector<256x128xf32>, vector<8x128xf32> -> vector<8x128xf32>
    %107 = vector.broadcast %7 : vector<1x128xf32> to vector<8x128xf32>
    %108 = arith.addf %106, %107 : vector<8x128xf32>
    %cst_53 = arith.constant 0.000000e+00 : f32
    %109 = vector.broadcast %cst_53 : f32 to vector<8x128xf32>
    %110 = arith.cmpf oge, %108, %109 : vector<8x128xf32>
    %cst_54 = arith.constant 0.00999999977 : f32
    %111 = vector.broadcast %cst_54 : f32 to vector<8x128xf32>
    %112 = arith.mulf %111, %108 : vector<8x128xf32>
    %113 = arith.select %110, %108, %112 : vector<8x128xi1>, vector<8x128xf32>
    %c0_55 = arith.constant 0 : index
    %c0_56 = arith.constant 0 : index
    %114 = vector.load %arg10[%c0_55, %c0_56] : memref<8x128xf32, #tpu.memory_space<vmem>>, vector<8x128xf32>
    tpu.vector_store %arg10[%c0_55, %c0_56], %113 {strides = array<i32>} : memref<8x128xf32, #tpu.memory_space<vmem>>, vector<8x128xf32>,
    return
  }
}

</mosaic_0001>

<bundles_post_ra>
// kernel: cnn_e_forward.1
= control target key start
LH: loop header
LB: loop body
LE: loop exit
PB: predicated region body
PF: predicated region fallthrough
CT: control target
= control target key end

     0   :  { %15 = vsyncpa [#allocation3], 0  ;;  %s7290_s0 = inlined_call_operand.vmem [shape: f32[8,16], index: 0, kind: input, shape index: {}]   ;;  %s7291_s1 = inlined_call_operand.vmem [shape: f32[16,384], index: 1, kind: input, shape index: {}]   ;;  %s7292_s2 = inlined_call_operand.hbm [shape: f32[1,2688], index: 2, kind: input, shape index: {}]   ;;  %s7293_s3 = inlined_call_operand.vmem [shape: bf16[384,20], index: 3, kind: input, shape index: {}]   ;;  %s7294_s4 = inlined_call_operand.hbm [shape: bf16[20,384], index: 4, kind: input, shape index: {}]   ;;  %s7295_s5 = inlined_call_operand.hbm [shape: bf16[384,640], index: 5, kind: input, shape index: {}]   ;;  %s7296_s6 = inlined_call_operand.vmem [shape: bf16[640,40], index: 6, kind: input, shape index: {}]   ;;  %s7297_s7 = inlined_call_operand.hbm [shape: bf16[40,640], index: 7, kind: input, shape index: {}]   ;;  %s7298_s8 = inlined_call_operand.vmem [shape: bf16[640,256], index: 8, kind: input, shape index: {}]   ;;  %s7299_s9 = inlined_call_operand.hbm [shape: f32[256,128], index: 9, kind: input, shape index: {}]   ;;  %s7300_s10 = inlined_call_operand.vmem [shape: f32[8,128], index: 10, kind: output, shape index: {}]  }
   0x1   :  { %16 = vsyncpa [#allocation5], 0 }
   0x2   :  { %17 = vsyncpa [#allocation8], 0  ;;  %s6081_s13 = smov [#allocation4]   ;;  %s5965_s17 = scalar_lea.hbm %s7294_s4, 576 }
   0x3   :  { %s39_s14 = sshll.u32 %s6081_s13, 4  ;;  %p5966_p0 = scmp.ne.s32.totalorder %s7294_s4, %s5965_s17  ;;  %s40_s14 = int_to_ptr.vmem [resolvable:$true] %s39_s14 }
   0x4   :  { %p5969_p1 = scmp.lt.u32.totalorder %s5965_s17, %s7294_s4 }
   0x6   :  { %p5971_p2 = pnand %p5969_p1, %p5966_p0 }
   0x8   :  { %5974 = shalt.err (!%p5971_p2)
}
   0x9   :  { %s5975_s22 = scalar_lea.vmem %s40_s14, 576  ;;  %p5980_p4 = scmp.lt.s32.totalorder %s40_s14, %s40_s14 }
   0xa   :  { %p5976_p3 = scmp.ne.s32.totalorder %s40_s14, %s5975_s22  ;;  %p5981_p5 = scmp.lt.s32.totalorder %s5975_s22, %s5975_s22 }
   0xc   :  { %p5982_p6 = por %p5981_p5, %p5980_p4 }
   0xe   :  { %p5983_p7 = pnand %p5982_p6, %p5976_p3 }
  0x10   :  { %5986 = shalt.err (!%p5983_p7)
}
  0x11   :  { %s6082_s23 = smov 192   ;;  %s6083_s24 = smov 12  }
  0x12   :  { %45 = dma.hbm_to_vmem [thread:$0]  %s7294_s4, 576, %s40_s14, [#allocation5], %s6082_s23, %s6082_s23, %s6083_s24  }
  0x13   :  { %s6084_s27 = smov [#allocation7]   ;;  %s6085_s29 = smov [#allocation2]  }
  0x14   :  { %s65_s28 = sshll.u32 %s6084_s27, 4  ;;  %s28_s30 = sshll.u32 %s6085_s29, 4  ;;  %s66_s28 = int_to_ptr.vmem [resolvable:$true] %s65_s28  ;;  %s29_s30 = int_to_ptr.vmem [resolvable:$true] %s28_s30 }
  0x15   :  { %s5987_s13 = scalar_lea.hbm %s7297_s7, 1600 }
  0x16   :  { %p5988_p8 = scmp.ne.s32.totalorder %s7297_s7, %s5987_s13  ;;  %p5991_p9 = scmp.lt.u32.totalorder %s5987_s13, %s7297_s7 }
  0x18   :  { %p5993_p10 = pnand %p5991_p9, %p5988_p8 }
  0x1a   :  { %5996 = shalt.err (!%p5993_p10)
}
  0x1b   :  { %s5997_s4 = scalar_lea.vmem %s66_s28, 1600  ;;  %p6002_p12 = scmp.lt.s32.totalorder %s66_s28, %s66_s28 }
  0x1c   :  { %p5998_p11 = scmp.ne.s32.totalorder %s66_s28, %s5997_s4  ;;  %p6003_p13 = scmp.lt.s32.totalorder %s5997_s4, %s5997_s4 }
  0x1e   :  { %p6004_p0 = por %p6003_p13, %p6002_p12 }
  0x20   :  { %p6005_p1 = pnand %p6004_p0, %p5998_p11 }
  0x22   :  { %6008 = shalt.err (!%p6005_p1)
}
  0x23   :  { %s6086_s14 = smov 320   ;;  %s6087_s19 = smov 20  }
  0x24   :  { %71 = dma.hbm_to_vmem [thread:$0]  %s7297_s7, 1600, %s66_s28, [#allocation8], %s6086_s14, %s6086_s14, %s6087_s19  }
  0x25   :  { %s6009_s24 = scalar_lea.hbm %s7292_s2, 336 }
  0x26   :  { %p6010_p2 = scmp.ne.s32.totalorder %s7292_s2, %s6009_s24  ;;  %p6013_p3 = scmp.lt.u32.totalorder %s6009_s24, %s7292_s2 }
  0x28   :  { %p6015_p4 = pnand %p6013_p3, %p6010_p2 }
  0x2a   :  { %6018 = shalt.err (!%p6015_p4)
}
  0x2b   :  { %s6019_s11 = scalar_lea.vmem %s29_s30, 336  ;;  %s6023_s12 = scalar_lea.vmem %s29_s30, 352 }
  0x2c   :  { %p6020_p5 = scmp.ne.s32.totalorder %s29_s30, %s6019_s11  ;;  %p6024_p6 = scmp.lt.s32.totalorder %s29_s30, %s29_s30 }
  0x2d   :  { %p6025_p7 = scmp.lt.s32.totalorder %s6023_s12, %s6019_s11 }
  0x2f   :  { %p6026_p8 = por %p6025_p7, %p6024_p6 }
  0x31   :  { %p6027_p9 = pnand %p6026_p8, %p6020_p5 }
  0x33   :  { %6030 = shalt.err (!%p6027_p9)
}
  0x34   :  { %31 = dma.hbm_to_vmem [thread:$0]  %s7292_s2, 336, %s29_s30, [#allocation3]  }
  0x35   :  { %s6088_s13 = smov [#allocation6]   ;;  %s6089_s16 = smov [#allocation9]  }
  0x36   :  { %s51_s15 = sshll.u32 %s6088_s13, 4  ;;  %s79_s17 = sshll.u32 %s6089_s16, 4  ;;  %s52_s15 = int_to_ptr.vmem [resolvable:$true] %s51_s15  ;;  %s80_s17 = int_to_ptr.vmem [resolvable:$true] %s79_s17 }
  0x37   :  { %s6031_s20 = scalar_lea.hbm %s7295_s5, 15360 }
  0x38   :  { %p6032_p10 = scmp.ne.s32.totalorder %s7295_s5, %s6031_s20  ;;  %p6035_p11 = scmp.lt.u32.totalorder %s6031_s20, %s7295_s5 }
  0x3a   :  { %p6037_p12 = pnand %p6035_p11, %p6032_p10 }
  0x3c   :  { %6040 = shalt.err (!%p6037_p12)
}
  0x3d   :  { %s6041_s2 = scalar_lea.vmem %s52_s15, 15360  ;;  %p6046_p0 = scmp.lt.s32.totalorder %s52_s15, %s52_s15 }
  0x3e   :  { %p6042_p13 = scmp.ne.s32.totalorder %s52_s15, %s6041_s2  ;;  %p6047_p1 = scmp.lt.s32.totalorder %s6041_s2, %s6041_s2 }
  0x40   :  { %p6048_p2 = por %p6047_p1, %p6046_p0 }
  0x42   :  { %p6049_p3 = pnand %p6048_p2, %p6042_p13 }
  0x44   :  { %6052 = shalt.err (!%p6049_p3)
}
  0x45   :  { %57 = dma.hbm_to_vmem [thread:$0]  %s7295_s5, 15360, %s52_s15, [#allocation5], %s6086_s14, %s6086_s14, %s6087_s19  }
  0x46   :  { %s6053_s29 = scalar_lea.hbm %s7299_s9, 4096 }
  0x47   :  { %p6054_p4 = scmp.ne.s32.totalorder %s7299_s9, %s6053_s29  ;;  %p6057_p5 = scmp.lt.u32.totalorder %s6053_s29, %s7299_s9 }
  0x49   :  { %p6059_p6 = pnand %p6057_p5, %p6054_p4 }
  0x4b   :  { %6062 = shalt.err (!%p6059_p6)
}
  0x4c   :  { %s6063_s13 = scalar_lea.vmem %s80_s17, 4096  ;;  %p6068_p8 = scmp.lt.s32.totalorder %s80_s17, %s80_s17 }
  0x4d   :  { %p6064_p7 = scmp.ne.s32.totalorder %s80_s17, %s6063_s13  ;;  %p6069_p9 = scmp.lt.s32.totalorder %s6063_s13, %s6063_s13 }
  0x4f   :  { %p6070_p10 = por %p6069_p9, %p6068_p8 }
  0x51   :  { %p6071_p11 = pnand %p6070_p10, %p6064_p7 }
  0x53   :  { %6074 = shalt.err (!%p6071_p11)
}
  0x54   :  { %s6090_s5 = smov 128   ;;  %s6091_s14 = smov 8  }
  0x55   :  { %85 = dma.hbm_to_vmem [thread:$0]  %s7299_s9, 4096, %s80_s17, [#allocation8], %s6090_s5, %s6090_s5, %s6091_s14  }
  0x56   :  { %6075 = dma.done.wait [#allocation3], 336  }
  0x57   :  { %6076 = vsyncadd [#allocation3], 4294966960 }
  0x58   :  { %6077 = dma.done.wait [#allocation5], 15936  }
  0x59   :  { %6078 = vsyncadd [#allocation5], 4294951360 }
  0x5a   :  { %6079 = dma.done.wait [#allocation8], 5696  }
  0x5b   :  { %6080 = vsyncadd [#allocation8], 4294961600  ;;  %v7302_v0 = vmov 0.0|0.0   ;;  %vm6093_vm0 = vmmov 0   ;;  %v7304_v1 = vmov 0.0   ;;  %v428_v2 = vld [vmem:[%s7291_s1 + $0x8] sm:$0xff]  ;;  %v421_v36 = vlaneseq }
  0x5c   :  { %5213 = vmatprep.subr.bf16.mxu1 %v7302_v0  ;;  %5002 = vmatprep.mubr.msk.f32.mxu1 %vm6093_vm0, %v7304_v1  ;;  %v431_v3 = vld [vmem:[%s7291_s1 + $0x20] sm:$0xff]  ;;  %v429_v4 = vld [vmem:[%s7291_s1 + $0x10] sm:$0xff]  ;;  %v432_v6 = vld [vmem:[%s7291_s1 + $0x28] sm:$0xff]  ;;  %vm449_vm1 = vcmask 130048   ;;  %vm760_vm3 = vcmask 1043456   ;;  %vm756_vm4 = vcmask 162816  }
  0x5d   :  { %517 = vmatprep.mubr.f32.mxu0 %v7304_v1  ;;  %v5209_v5 = vpack.c.bf16 %v431_v3, %v428_v2  ;;  %v427_v7 = vld [vmem:[%s7291_s1] sm:$0xff]  ;;  %v430_v8 = vld [vmem:[%s7291_s1 + $0x18] sm:$0xff]  ;;  %v5214_v9 = vpack.c.bf16 %v432_v6, %v429_v4  ;;  %v6262_v15 = vld [vmem:[%s7293_s3 + $0x48] sm:$0xff]   ;;  %v6397_v37 = vshrl.u32 %v421_v36, 7  ;;  %vm2568_vm8 = vcmask 326656  }
  0x5e   :  { %v5211_v10 = vpack.c.bf16 %v430_v8, %v427_v7  ;;  %v6242_v11 = vld [vmem:[%s7293_s3 + $0x40] sm:$0xff]   ;;  %v6267_v16 = vld [vmem:[%s7293_s3 + $0x88] sm:$0xff]   ;;  %v6279_v18 = vld [vmem:[%s7293_s3 + $0x50] sm:$0xff]  }
  0x5f   :  { %5210 = vmatprep.subr.bf16.mxu0 %v5209_v5  ;;  %5215 = vmatpush3.bf16.msra.mxu1 %v5214_v9  ;;  %v426_v12 = vld [vmem:[%s7290_s0] sm:$0xff]  ;;  %v6272_v17 = vld [vmem:[%s7293_s3 + $0x8] sm:$0xff]   ;;  %v6288_v19 = vld [vmem:[%s7293_s3 + $0x90] sm:$0xff]   ;;  %v6400_v38 = vsub.s32 0, %v6397_v37  ;;  %v6403_v39 = vsub.s32 2, %v6397_v37  ;;  %v6406_v41 = vsub.s32 1, %v6397_v37 }
  0x60   :  { %5212 = vmatpush1.bf16.msra.mxu0 %v5211_v10  ;;  %5248 = vmatprep.subr.bf16.mxu1 %v7302_v0  ;;  %v6251_v13 = vld [vmem:[%s7293_s3 + $0x80] sm:$0xff]   ;;  %v6293_v20 = vld [vmem:[%s7293_s3 + $0x10] sm:$0xff]   ;;  %v6302_v21 = vld [vmem:[%s7293_s3 + $0x98] sm:$0xff]   ;;  %vm423_vm2 = vcmp.lt.s32.totalorder %v6397_v37, 2 }
  0x61   :  { %5217 = vmatprep.subr.bf16.mxu0 %v6242_v11  ;;  %v6257_v14 = vld [vmem:[%s7293_s3] sm:$0xff]   ;;  %v6312_v22 = vld [vmem:[%s7293_s3 + $0x58] sm:$0xff]   ;;  %v6343_v27 = vld [vmem:[%s7293_s3 + $0xa8] sm:$0xff]   ;;  %7311 = vst [vmem:[#allocation13_spill] sm:$0xff] %v6403_v39  ;;  %v6413_v45 = vsel %vm423_vm2, 1.0, %v7304_v1 }
  0x62   :  { %5003 = vmatmul.mubr.msk.f32.vlgmr.msra.gmra.mrb[0].mxu1 %vm449_vm1, %v426_v12  ;;  %v6318_v23 = vld [vmem:[%s7293_s3 + $0x18] sm:$0xff]   ;;  %v6324_v24 = vld [vmem:[%s7293_s3 + $0xa0] sm:$0xff]   ;;  %v6349_v28 = vld [vmem:[%s7293_s3 + $0x68] sm:$0xff]   ;;  %7312 = vst [vmem:[#allocation14_spill] sm:$0xff] %v6406_v41 }
  0x63   :  { %4094 = vmatmul.mubr.msk.f32.vlgmr.msra.gmra.mrb[0].mxu0 %vm449_vm1, %v426_v12  ;;  %5250 = vmatpush3.bf16.msra.mxu1 %v6251_v13  ;;  %v6330_v25 = vld [vmem:[%s7293_s3 + $0x60] sm:$0xff]   ;;  %v6356_v29 = vld [vmem:[%s7293_s3 + $0x28] sm:$0xff]   ;;  %v6362_v30 = vld [vmem:[%s7293_s3 + $0xb0] sm:$0xff]  }
  0x64   :  { %5219 = vmatpush3.bf16.msra.mxu0 %v6257_v14  ;;  %5251 = vmatprep.subr.bf16.mxu1 %v7302_v0  ;;  %v6337_v26 = vld [vmem:[%s7293_s3 + $0x20] sm:$0xff]   ;;  %v6368_v31 = vld [vmem:[%s7293_s3 + $0x70] sm:$0xff]   ;;  %v6381_v33 = vld [vmem:[%s7293_s3 + $0xb8] sm:$0xff]  }
  0x65   :  { %5221 = vmatprep.subr.bf16.mxu0 %v6262_v15  ;;  %5037 = vmatprep.mubr.msk.f32.mxu1 %vm6093_vm0, %v7304_v1  ;;  %v6375_v32 = vld [vmem:[%s7293_s3 + $0x30] sm:$0xff]   ;;  %v6386_v34 = vld [vmem:[%s7293_s3 + $0x78] sm:$0xff]   ;;  %v102_v40 = vld [vmem:[#allocation2] sm:$0x7] }
  0x66   :  { %v6393_v35 = vld [vmem:[%s7293_s3 + $0x38] sm:$0xff]   ;;  %v445_v42 = vrot.slane %v102_v40, %v6403_v39  ;;  %v437_v43 = vrot.slane %v102_v40, %v6400_v38  ;;  %v441_v44 = vrot.slane %v102_v40, %v6406_v41 }
  0x67   :  { %5253 = vmatpush3.bf16.msra.mxu1 %v6267_v16  ;;  %v5655_v36 = vld [vmem:[#allocation4 + $0x4] ss:$12 sps:$4 sm:$0xff]   ;;  %v6430_v40 = vld [vmem:[#allocation4] ss:$12 sps:$4 sm:$0xff]  }
  0x68   :  { %5223 = vmatpush3.bf16.msra.mxu0 %v6272_v17  ;;  %5254 = vmatprep.subr.bf16.mxu1 %v7302_v0 }
  0x69   :  { %5225 = vmatprep.subr.bf16.mxu0 %v6279_v18 }
  0x6b   :  { %5256 = vmatpush3.bf16.msra.mxu1 %v6288_v19 }
  0x6c   :  { %5227 = vmatpush3.bf16.msra.mxu0 %v6293_v20  ;;  %5257 = vmatprep.subr.bf16.mxu1 %v7302_v0 }
  0x6d   :  { %5229 = vmatprep.subr.bf16.mxu0 %v6312_v22 }
  0x6f   :  { %5259 = vmatpush3.bf16.msra.mxu1 %v6302_v21 }
  0x70   :  { %5260 = vmatprep.subr.bf16.mxu1 %v7302_v0  ;;  %5231 = vmatpush3.bf16.msra.mxu0 %v6318_v23 }
  0x71   :  { %5233 = vmatprep.subr.bf16.mxu0 %v6330_v25 }
  0x73   :  { %5262 = vmatpush3.bf16.msra.mxu1 %v6324_v24 }
  0x74   :  { %5263 = vmatprep.subr.bf16.mxu1 %v7302_v0  ;;  %5235 = vmatpush3.bf16.msra.mxu0 %v6337_v26 }
  0x75   :  { %5237 = vmatprep.subr.bf16.mxu0 %v6349_v28 }
  0x77   :  { %5265 = vmatpush3.bf16.msra.mxu1 %v6343_v27 }
  0x78   :  { %5266 = vmatprep.subr.bf16.mxu1 %v7302_v0  ;;  %5239 = vmatpush3.bf16.msra.mxu0 %v6356_v29 }
  0x79   :  { %5241 = vmatprep.subr.bf16.mxu0 %v6368_v31 }
  0x7b   :  { %5268 = vmatpush3.bf16.msra.mxu1 %v6362_v30 }
  0x7c   :  { %5269 = vmatprep.subr.bf16.mxu1 %v7302_v0  ;;  %5243 = vmatpush3.bf16.msra.mxu0 %v6375_v32 }
  0x7d   :  { %5245 = vmatprep.subr.bf16.mxu0 %v6386_v34 }
  0x7f   :  { %5271 = vmatpush3.bf16.msra.mxu1 %v6381_v33 }
  0x80   :  { %5276 = vmatprep.subr.bf16.mxu1 %v7302_v0  ;;  %5247 = vmatpush3.bf16.msra.mxu0 %v6393_v35 }
  0x81   :  { %5273 = vmatprep.subr.bf16.mxu0 %v5655_v36 }
 0x135   :  { %v590_v46 = vpop.f32.mrb[0].mxu1 }
 0x136   :  { %v519_v47 = vpop.f32.mrb[0].mxu0  ;;  %v6415_v48 = vadd.f32 %v590_v46, %v445_v42  ;;  %v5004_v51 = vpop.f32.mrb[1].mxu1  ;;  %v6432_v42 = vld [vmem:[#allocation4 + $0x8] ss:$12 sps:$4 sm:$0xff]   ;;  %v6440_v46 = vld [vmem:[#allocation4 + $0x20] sm:$0x3] }
 0x137   :  { %v6417_v49 = vadd.f32 %v519_v47, %v437_v43  ;;  %v521_v50 = vpop.f32.mrb[1].mxu0  ;;  %v6436_v43 = vld [vmem:[#allocation4 + $0x18] sm:$0x33] }
 0x138   :  { %v6419_v52 = vadd.f32 %v521_v50, %v441_v44  ;;  %v596_v53 = vmul.f32 %v6413_v45, %v6415_v48  ;;  %v219_v44 = vunpack.c.h.bf16 %v6436_v43  ;;  %v218_v47 = vunpack.c.l.bf16 %v6436_v43 }
 0x139   :  { %v594_v54 = vmul.f32 %v6413_v45, %v6417_v49  ;;  %v220_v50 = vunpack.c.l.bf16 %v6440_v46  ;;  %v5659_v46 = vld [vmem:[#allocation6] ss:$20 sps:$4 sm:$0xff]  }
 0x13a   :  { %v595_v55 = vmul.f32 %v6413_v45, %v6419_v52  ;;  %v609_v56 = vrot.slane %v596_v53, 4 }
 0x13b   :  { %v597_v57 = vrot.slane %v594_v54, 4 }
 0x13c   :  { %v603_v58 = vrot.slane %v595_v55, 4  ;;  %v610_v59 = vadd.f32 %v609_v56, %v596_v53 }
 0x13d   :  { %v598_v60 = vadd.f32 %v597_v57, %v594_v54 }
 0x13e   :  { %v604_v61 = vadd.f32 %v603_v58, %v595_v55  ;;  %v611_v62 = vrot.slane %v610_v59, 2 }
 0x13f   :  { %v599_v63 = vrot.slane %v598_v60, 2 }
 0x140   :  { %v605_v2 = vrot.slane %v604_v61, 2  ;;  %v612_v3 = vadd.f32 %v611_v62, %v610_v59 }
 0x141   :  { %v600_v4 = vadd.f32 %v599_v63, %v598_v60 }
 0x142   :  { %v606_v5 = vadd.f32 %v605_v2, %v604_v61  ;;  %v613_v6 = vrot.slane %v612_v3, 1 }
 0x143   :  { %v601_v7 = vrot.slane %v600_v4, 1 }
 0x144   :  { %v607_v8 = vrot.slane %v606_v5, 1  ;;  %v614_v9 = vadd.f32 %v613_v6, %v612_v3 }
 0x145   :  { %v602_v12 = vadd.f32 %v601_v7, %v600_v4  ;;  %v5661_v4 = vld [vmem:[#allocation6 + $0x4] ss:$20 sps:$4 sm:$0xff]  }
 0x146   :  { %v608_v10 = vadd.f32 %v607_v8, %v606_v5  ;;  %5038 = vmatmul.mubr.f32.vlgmr.msra.gmra.mrb[2].mxu1 %v614_v9  ;;  %v5685_v5 = vld [vmem:[#allocation6 + $0x284] ss:$20 sps:$4 sm:$0xff]  }
 0x147   :  { %5046 = vmatprep.mubr.msk.f32.mxu1 %vm6093_vm0, %v7304_v1  ;;  %5278 = vmatpush3.bf16.msra.mxu1 %v6432_v42 }
 0x148   :  { %679 = vmatprep.mubr.f32.mxu0 %v608_v10  ;;  %5044 = vmatprep.subr.mxu1 %v7304_v1 }
 0x149   :  { %680 = vmatmul.mubr.f32.vlgmr.msra.gmra.mrb[2].mxu0 %v602_v12 }
 0x14a   :  { %834 = vmatprep.mubr.f32.mxu0 %v7304_v1  ;;  %5275 = vmatpush1.bf16.msra.mxu0 %v6430_v40 }
 0x14b   :  { %4096 = vmatprep.subr.msk.mxu0 %vm760_vm3, %v219_v44  ;;  %5045 = vmatpush3.msk.msra.mxu1 %vm760_vm3, %v220_v50 }
 0x14c   :  { %5311 = vmatprep.subr.bf16.mxu1 %v7302_v0 }
 0x14e   :  { %4097 = vmatpush1.msk.msra.mxu0 %vm760_vm3, %v218_v47 }
 0x14f   :  { %5280 = vmatprep.subr.bf16.mxu0 %v6242_v11 }
 0x219   :  { %v751_v51 = vpop.f32.mrb[2].mxu1 }
 0x21a   :  { %v5039_v53 = vpop.f32.mrb[3].mxu1 }
 0x21b   :  { %v5662_v53 = vld [vmem:[#allocation6 + $0x28] ss:$20 sps:$4 sm:$0xff]  }
 0x21c   :  { %v4666_v54 = vpop.f32.mrb[2].mxu0 }
 0x21d   :  { %v4667_v55 = vpop.f32.mrb[3].mxu0 }
 0x21e   :  { %v4668_v56 = vadd.f32 %v4667_v55, %v4666_v54  ;;  %v5689_v54 = vld [vmem:[#allocation6 + $0x2a8] ss:$20 sps:$4 sm:$0xff]  }
 0x21f   :  { %v5667_v55 = vld [vmem:[#allocation6 + $0x54] ss:$20 sps:$4 sm:$0xff]  }
 0x220   :  { %v752_v57 = vadd.f32 %v4668_v56, %v751_v51  ;;  %v5664_v51 = vld [vmem:[#allocation6 + $0x2c] ss:$20 sps:$4 sm:$0xff]   ;;  %v5697_v56 = vld [vmem:[#allocation6 + $0x2d4] ss:$20 sps:$4 sm:$0xff]  }
 0x222   :  { %v755_v58 = vmul.f32 0.035714287, %v752_v57  ;;  %v5665_v57 = vld [vmem:[#allocation6 + $0x50] ss:$20 sps:$4 sm:$0xff]  }
 0x224   :  { %4098 = vmatmul.mubr.msk.f32.vlgmr.msra.gmra.mrb[4].mxu0 %vm756_vm4, %v755_v58  ;;  %5047 = vmatmul.mubr.msk.f32.vlgmr.msra.gmra.mrb[4].mxu1 %vm756_vm4, %v755_v58  ;;  %v5695_v58 = vld [vmem:[#allocation6 + $0x2d0] ss:$20 sps:$4 sm:$0xff]  }
 0x225   :  { %5313 = vmatpush3.bf16.msra.mxu1 %v6251_v13  ;;  %5282 = vmatpush3.bf16.msra.mxu0 %v6257_v14 }
 0x226   :  { %5314 = vmatprep.subr.bf16.mxu1 %v7302_v0  ;;  %5284 = vmatprep.subr.bf16.mxu0 %v6262_v15 }
 0x227   :  { %5081 = vmatprep.mubr.msk.f32.mxu1 %vm6093_vm0, %v7304_v1 }
 0x229   :  { %5316 = vmatpush3.bf16.msra.mxu1 %v6267_v16  ;;  %5286 = vmatpush3.bf16.msra.mxu0 %v6272_v17 }
 0x22a   :  { %5317 = vmatprep.subr.bf16.mxu1 %v7302_v0  ;;  %5288 = vmatprep.subr.bf16.mxu0 %v6279_v18 }
 0x22d   :  { %5319 = vmatpush3.bf16.msra.mxu1 %v6288_v19  ;;  %5290 = vmatpush3.bf16.msra.mxu0 %v6293_v20 }
 0x22e   :  { %5320 = vmatprep.subr.bf16.mxu1 %v7302_v0  ;;  %5292 = vmatprep.subr.bf16.mxu0 %v6312_v22 }
 0x231   :  { %5322 = vmatpush3.bf16.msra.mxu1 %v6302_v21  ;;  %5294 = vmatpush3.bf16.msra.mxu0 %v6318_v23 }
 0x232   :  { %5323 = vmatprep.subr.bf16.mxu1 %v7302_v0  ;;  %5296 = vmatprep.subr.bf16.mxu0 %v6330_v25 }
 0x235   :  { %5325 = vmatpush3.bf16.msra.mxu1 %v6324_v24  ;;  %5298 = vmatpush3.bf16.msra.mxu0 %v6337_v26 }
 0x236   :  { %5326 = vmatprep.subr.bf16.mxu1 %v7302_v0  ;;  %5300 = vmatprep.subr.bf16.mxu0 %v6349_v28 }
 0x239   :  { %5328 = vmatpush3.bf16.msra.mxu1 %v6343_v27  ;;  %5302 = vmatpush3.bf16.msra.mxu0 %v6356_v29 }
 0x23a   :  { %5329 = vmatprep.subr.bf16.mxu1 %v7302_v0  ;;  %5304 = vmatprep.subr.bf16.mxu0 %v6368_v31 }
 0x23d   :  { %5331 = vmatpush3.bf16.msra.mxu1 %v6362_v30  ;;  %5306 = vmatpush3.bf16.msra.mxu0 %v6375_v32 }
 0x23e   :  { %5332 = vmatprep.subr.bf16.mxu1 %v7302_v0  ;;  %5308 = vmatprep.subr.bf16.mxu0 %v6386_v34 }
 0x241   :  { %5334 = vmatpush3.bf16.msra.mxu1 %v6381_v33  ;;  %5310 = vmatpush3.bf16.msra.mxu0 %v6393_v35 }
 0x242   :  { %5336 = vmatprep.subr.bf16.mxu0 %v5655_v36  ;;  %5339 = vmatprep.subr.bf16.mxu1 %v7302_v0 }
 0x2f7   :  { %v836_v11 = vpop.f32.mrb[4].mxu0  ;;  %v907_v13 = vpop.f32.mrb[4].mxu1 }
 0x2f8   :  { %v914_v14 = vrot.slane %v836_v11, %v6400_v38  ;;  %v922_v15 = vrot.slane %v907_v13, %v6400_v38  ;;  %v838_v16 = vpop.f32.mrb[5].mxu0  ;;  %v5048_v17 = vpop.f32.mrb[5].mxu1  ;;  %v5670_v11 = vld [vmem:[#allocation6 + $0x7c] ss:$20 sps:$4 sm:$0xff]  }
 0x2f9   :  { %v918_v18 = vrot.slane %v838_v16, %v6400_v38  ;;  %v5703_v13 = vld [vmem:[#allocation6 + $0x2fc] ss:$20 sps:$4 sm:$0xff]   ;;  %v5673_v16 = vld [vmem:[#allocation6 + $0xa4] ss:$20 sps:$4 sm:$0xff]  }
 0x2fa   :  { %v6494_v19 = vsub.f32 %v6417_v49, %v914_v14  ;;  %v6497_v20 = vsub.f32 %v6415_v48, %v922_v15  ;;  %v5668_v14 = vld [vmem:[#allocation6 + $0x78] ss:$20 sps:$4 sm:$0xff]  }
 0x2fb   :  { %v6500_v21 = vsub.f32 %v6419_v52, %v918_v18  ;;  %v5701_v15 = vld [vmem:[#allocation6 + $0x2f8] ss:$20 sps:$4 sm:$0xff]   ;;  %v5671_v18 = vld [vmem:[#allocation6 + $0xa0] ss:$20 sps:$4 sm:$0xff]  }
 0x2fc   :  { %v926_v22 = vmul.f32 %v6494_v19, %v6494_v19  ;;  %v928_v23 = vmul.f32 %v6497_v20, %v6497_v20  ;;  %v5709_v17 = vld [vmem:[#allocation6 + $0x324] ss:$20 sps:$4 sm:$0xff]  }
 0x2fd   :  { %v927_v24 = vmul.f32 %v6500_v21, %v6500_v21 }
 0x2fe   :  { %v929_v25 = vmul.f32 %v6413_v45, %v926_v22  ;;  %v931_v26 = vmul.f32 %v6413_v45, %v928_v23  ;;  %v5707_v22 = vld [vmem:[#allocation6 + $0x320] ss:$20 sps:$4 sm:$0xff]  }
 0x2ff   :  { %v930_v27 = vmul.f32 %v6413_v45, %v927_v24  ;;  %v5676_v23 = vld [vmem:[#allocation6 + $0xcc] ss:$20 sps:$4 sm:$0xff]  }
 0x300   :  { %v932_v28 = vrot.slane %v929_v25, 4  ;;  %v944_v29 = vrot.slane %v931_v26, 4  ;;  %v5715_v24 = vld [vmem:[#allocation6 + $0x34c] ss:$20 sps:$4 sm:$0xff]  }
 0x301   :  { %v938_v30 = vrot.slane %v930_v27, 4 }
 0x302   :  { %v933_v31 = vadd.f32 %v932_v28, %v929_v25  ;;  %v945_v32 = vadd.f32 %v944_v29, %v931_v26  ;;  %v5674_v25 = vld [vmem:[#allocation6 + $0xc8] ss:$20 sps:$4 sm:$0xff]   ;;  %v5677_v28 = vld [vmem:[#allocation6 + $0xf0] ss:$20 sps:$4 sm:$0xff]  }
 0x303   :  { %v939_v33 = vadd.f32 %v938_v30, %v930_v27  ;;  %v5713_v26 = vld [vmem:[#allocation6 + $0x348] ss:$20 sps:$4 sm:$0xff]   ;;  %v5680_v30 = vld [vmem:[#allocation6 + $0x118] ss:$20 sps:$4 sm:$0xff]  }
 0x304   :  { %v934_v34 = vrot.slane %v933_v31, 2  ;;  %v946_v35 = vrot.slane %v945_v32, 2  ;;  %v5679_v27 = vld [vmem:[#allocation6 + $0xf4] ss:$20 sps:$4 sm:$0xff]   ;;  %v5682_v29 = vld [vmem:[#allocation6 + $0x11c] ss:$20 sps:$4 sm:$0xff]  }
 0x305   :  { %v940_v48 = vrot.slane %v939_v33, 2 }
 0x306   :  { %v947_v49 = vadd.f32 %v946_v35, %v945_v32  ;;  %v935_v52 = vadd.f32 %v934_v34, %v933_v31  ;;  %v5688_v31 = vld [vmem:[#allocation6 + $0x144] ss:$20 sps:$4 sm:$0xff]   ;;  %v5686_v32 = vld [vmem:[#allocation6 + $0x140] ss:$20 sps:$4 sm:$0xff]   ;;  %v5692_v34 = vld [vmem:[#allocation6 + $0x168] ss:$20 sps:$4 sm:$0xff]  }
 0x307   :  { %v941_v59 = vadd.f32 %v940_v48, %v939_v33  ;;  %v5694_v33 = vld [vmem:[#allocation6 + $0x16c] ss:$20 sps:$4 sm:$0xff]   ;;  %v5700_v35 = vld [vmem:[#allocation6 + $0x194] ss:$20 sps:$4 sm:$0xff]   ;;  %v5698_v48 = vld [vmem:[#allocation6 + $0x190] ss:$20 sps:$4 sm:$0xff]  }
 0x308   :  { %v948_v60 = vrot.slane %v947_v49, 1  ;;  %v936_v61 = vrot.slane %v935_v52, 1 }
 0x309   :  { %v942_v62 = vrot.slane %v941_v59, 1 }
 0x30a   :  { %v949_v63 = vadd.f32 %v948_v60, %v947_v49  ;;  %v937_v3 = vadd.f32 %v936_v61, %v935_v52  ;;  %v5706_v49 = vld [vmem:[#allocation6 + $0x1bc] ss:$20 sps:$4 sm:$0xff]   ;;  %v5704_v52 = vld [vmem:[#allocation6 + $0x1b8] ss:$20 sps:$4 sm:$0xff]   ;;  %v5710_v60 = vld [vmem:[#allocation6 + $0x1e0] ss:$20 sps:$4 sm:$0xff]  }
 0x30b   :  { %v943_v2 = vadd.f32 %v942_v62, %v941_v59  ;;  %v5712_v59 = vld [vmem:[#allocation6 + $0x1e4] ss:$20 sps:$4 sm:$0xff]   ;;  %v5718_v61 = vld [vmem:[#allocation6 + $0x20c] ss:$20 sps:$4 sm:$0xff]   ;;  %v5716_v62 = vld [vmem:[#allocation6 + $0x208] ss:$20 sps:$4 sm:$0xff]  }
 0x30c   :  { %5082 = vmatmul.mubr.f32.vlgmr.msra.gmra.mrb[6].mxu1 %v949_v63  ;;  %v5721_v63 = vld [vmem:[#allocation6 + $0x374] ss:$20 sps:$4 sm:$0xff]  }
 0x30d   :  { %1014 = vmatprep.mubr.f32.mxu0 %v943_v2  ;;  %5341 = vmatpush3.bf16.msra.mxu1 %v6432_v42  ;;  %v104_v42 = vld [vmem:[#allocation2 + $0x6] sm:$0x1]  ;;  %v5719_v2 = vld [vmem:[#allocation6 + $0x370] ss:$20 sps:$4 sm:$0xff]  }
 0x30e   :  { %1015 = vmatmul.mubr.f32.vlgmr.msra.gmra.mrb[6].mxu0 %v937_v3  ;;  %5088 = vmatprep.subr.mxu1 %v7304_v1  ;;  %v5724_v3 = vld [vmem:[#allocation6 + $0x234] ss:$20 sps:$4 sm:$0xff]  }
 0x30f   :  { %5338 = vmatpush1.bf16.msra.mxu0 %v6430_v40  ;;  %1161 = vmatprep.mubr.f32.mxu0 %v7304_v1 }
 0x310   :  { %4101 = vmatprep.subr.msk.mxu0 %vm760_vm3, %v219_v44  ;;  %5090 = vmatprep.mubr.msk.f32.mxu1 %vm6093_vm0, %v7304_v1 }
 0x311   :  { %5089 = vmatpush3.msk.msra.mxu1 %vm760_vm3, %v220_v50  ;;  %v5683_v50 = vld [vmem:[#allocation6 + $0x280] ss:$20 sps:$4 sm:$0xff]  }
 0x312   :  { %2078 = vmatprep.subr.bf16.mxu1 %v5661_v4  ;;  %v5722_v4 = vld [vmem:[#allocation6 + $0x230] ss:$20 sps:$4 sm:$0xff]  }
 0x313   :  { %4102 = vmatpush1.msk.msra.mxu0 %vm760_vm3, %v218_v47  ;;  %v5691_v47 = vld [vmem:[#allocation6 + $0x2ac] ss:$20 sps:$4 sm:$0xff]  }
 0x314   :  { %2119 = vmatprep.subr.bf16.mxu0 %v5685_v5  ;;  %v5727_v5 = vld [vmem:[#allocation6 + $0x39c] ss:$20 sps:$4 sm:$0xff]  }
 0x3df   :  { %v1086_v6 = vpop.f32.mrb[6].mxu1 }
 0x3e0   :  { %v5083_v7 = vpop.f32.mrb[7].mxu1 }
 0x3e1   :  { %v4722_v8 = vpop.f32.mrb[6].mxu0  ;;  %v5728_v7 = vld [vmem:[#allocation6 + $0x258] ss:$20 sps:$4 sm:$0xff]  }
 0x3e2   :  { %v4723_v9 = vpop.f32.mrb[7].mxu0 }
 0x3e3   :  { %v4724_v10 = vadd.f32 %v4723_v9, %v4722_v8  ;;  %v5730_v8 = vld [vmem:[#allocation6 + $0x25c] ss:$20 sps:$4 sm:$0xff]  }
 0x3e4   :  { %v5731_v9 = vld [vmem:[#allocation6 + $0x150] ss:$20 sps:$4 sm:$0xff]  }
 0x3e5   :  { %v1087_v12 = vadd.f32 %v4724_v10, %v1086_v6  ;;  %v5725_v6 = vld [vmem:[#allocation6 + $0x398] ss:$20 sps:$4 sm:$0xff]   ;;  %v7301_v10 = vmov 0  }
 0x3e7   :  { %v1090_v36 = vmul.f32 0.035714287, %v1087_v12  ;;  %v5735_v12 = vld [vmem:[#allocation6 + $0xc] ss:$20 sps:$4 sm:$0xff]  }
 0x3e9   :  { %v1091_v40 = vadd.f32 1e-05, %v1090_v36  ;;  %v103_v36 = vld [vmem:[#allocation2 + $0x3] sm:$0x7] }
 0x3eb   :  { %5961 = vrsqrt.f32 %v1091_v40 }
 0x3f5   :  { %v5962_v44 = vpop.eup %5961 }
 0x3f6   :  { %v1093_v43 = vmul.f32 %v5962_v44, %v104_v42 }
 0x3f8   :  { %4103 = vmatmul.mubr.msk.f32.vlgmr.msra.gmra.mrb[8].mxu0 %vm756_vm4, %v1093_v43  ;;  %5091 = vmatmul.mubr.msk.f32.vlgmr.msra.gmra.mrb[8].mxu1 %vm756_vm4, %v1093_v43  ;;  %v1265_v43 = vrot.slane %v103_v36, %v6403_v39 }
 0x3f9   :  { %2079 = vmatpush1.bf16.msra.mxu1 %v5659_v46  ;;  %2120 = vmatpush1.bf16.msra.mxu0 %v5683_v50  ;;  %v1257_v46 = vrot.slane %v103_v36, %v6400_v38 }
 0x3fa   :  { %2080 = vmatprep.subr.bf16.mxu1 %v5664_v51  ;;  %2121 = vmatprep.subr.bf16.mxu0 %v5691_v47 }
 0x3fb   :  { %2151 = vmatprep.mubr.bf16.mxu0 %v7301_v10 }
 0x3fd   :  { %2081 = vmatpush1.bf16.msra.mxu1 %v5662_v53  ;;  %2122 = vmatpush1.bf16.msra.mxu0 %v5689_v54  ;;  %v1261_v54 = vrot.slane %v103_v36, %v6406_v41  ;;  %v6547_v36 = vld [vmem:[%s7296_s6 + $0x40] sm:$0xff]  }
 0x3fe   :  { %2082 = vmatprep.subr.bf16.mxu1 %v5667_v55  ;;  %2123 = vmatprep.subr.bf16.mxu0 %v5697_v56 }
 0x401   :  { %2083 = vmatpush1.bf16.msra.mxu1 %v5665_v57  ;;  %2124 = vmatpush1.bf16.msra.mxu0 %v5695_v58 }
 0x402   :  { %2084 = vmatprep.subr.bf16.mxu1 %v5670_v11  ;;  %2125 = vmatprep.subr.bf16.mxu0 %v5703_v13 }
 0x405   :  { %2085 = vmatpush1.bf16.msra.mxu1 %v5668_v14  ;;  %2126 = vmatpush1.bf16.msra.mxu0 %v5701_v15 }
 0x406   :  { %2086 = vmatprep.subr.bf16.mxu1 %v5673_v16  ;;  %2127 = vmatprep.subr.bf16.mxu0 %v5709_v17 }
 0x409   :  { %2087 = vmatpush1.bf16.msra.mxu1 %v5671_v18  ;;  %2128 = vmatpush1.bf16.msra.mxu0 %v5707_v22  ;;  %v5732_v18 = vld [vmem:[#allocation6 + $0x10] ss:$20 sps:$4 sm:$0xff]  }
 0x40a   :  { %2088 = vmatprep.subr.bf16.mxu1 %v5676_v23  ;;  %2129 = vmatprep.subr.bf16.mxu0 %v5715_v24 }
 0x40d   :  { %2089 = vmatpush1.bf16.msra.mxu1 %v5674_v25  ;;  %2130 = vmatpush1.bf16.msra.mxu0 %v5713_v26  ;;  %v5733_v25 = vld [vmem:[#allocation6 + $0x8] ss:$20 sps:$4 sm:$0xff]  }
 0x40e   :  { %2090 = vmatprep.subr.bf16.mxu1 %v5679_v27  ;;  %2131 = vmatprep.subr.bf16.mxu0 %v5721_v63  ;;  %v5740_v26 = vld [vmem:[#allocation6 + $0x34] ss:$20 sps:$4 sm:$0xff]   ;;  %v5737_v27 = vld [vmem:[#allocation6 + $0x38] ss:$20 sps:$4 sm:$0xff]  }
 0x40f   :  { %v5757_v63 = vld [vmem:[#allocation6 + $0xd8] ss:$20 sps:$4 sm:$0xff]  }
 0x411   :  { %2091 = vmatpush1.bf16.msra.mxu1 %v5677_v28  ;;  %2132 = vmatpush1.bf16.msra.mxu0 %v5719_v2  ;;  %v5741_v28 = vld [vmem:[#allocation6 + $0x1a0] ss:$20 sps:$4 sm:$0xff]  }
 0x412   :  { %2092 = vmatprep.subr.bf16.mxu1 %v5682_v29  ;;  %2133 = vmatprep.subr.bf16.mxu0 %v5727_v5  ;;  %v5738_v29 = vld [vmem:[#allocation6 + $0x30] ss:$20 sps:$4 sm:$0xff]   ;;  %v5761_v2 = vld [vmem:[#allocation6 + $0x240] ss:$20 sps:$4 sm:$0xff]  }
 0x413   :  { %v5762_v5 = vld [vmem:[#allocation6 + $0x100] ss:$20 sps:$4 sm:$0xff]  }
 0x415   :  { %2093 = vmatpush1.bf16.msra.mxu1 %v5680_v30  ;;  %2134 = vmatpush1.bf16.msra.mxu0 %v5725_v6  ;;  %v5745_v30 = vld [vmem:[#allocation6 + $0x5c] ss:$20 sps:$4 sm:$0xff]  }
 0x416   :  { %2094 = vmatprep.subr.bf16.mxu1 %v5688_v31  ;;  %4746 = vmatprep.subr.bf16.mxu0 %v5731_v9  ;;  %v5742_v31 = vld [vmem:[#allocation6 + $0x60] ss:$20 sps:$4 sm:$0xff]   ;;  %v5766_v6 = vld [vmem:[#allocation6 + $0x268] ss:$20 sps:$4 sm:$0xff]  }
 0x417   :  { %v5767_v9 = vld [vmem:[#allocation6 + $0x128] ss:$20 sps:$4 sm:$0xff]  }
 0x419   :  { %2095 = vmatpush1.bf16.msra.mxu1 %v5686_v32  ;;  %v5746_v32 = vld [vmem:[#allocation6 + $0x1c8] ss:$20 sps:$4 sm:$0xff]  }
 0x41a   :  { %2096 = vmatprep.subr.bf16.mxu1 %v5694_v33  ;;  %v5743_v33 = vld [vmem:[#allocation6 + $0x58] ss:$20 sps:$4 sm:$0xff]  }
 0x41d   :  { %2097 = vmatpush1.bf16.msra.mxu1 %v5692_v34  ;;  %v5750_v34 = vld [vmem:[#allocation6 + $0x84] ss:$20 sps:$4 sm:$0xff]  }
 0x41e   :  { %2098 = vmatprep.subr.bf16.mxu1 %v5700_v35  ;;  %v5747_v35 = vld [vmem:[#allocation6 + $0x88] ss:$20 sps:$4 sm:$0xff]  }
 0x421   :  { %2099 = vmatpush1.bf16.msra.mxu1 %v5698_v48  ;;  %v5751_v48 = vld [vmem:[#allocation6 + $0x1f0] ss:$20 sps:$4 sm:$0xff]  }
 0x422   :  { %2100 = vmatprep.subr.bf16.mxu1 %v5706_v49  ;;  %v5748_v49 = vld [vmem:[#allocation6 + $0x80] ss:$20 sps:$4 sm:$0xff]  }
 0x425   :  { %2101 = vmatpush1.bf16.msra.mxu1 %v5704_v52  ;;  %v5755_v52 = vld [vmem:[#allocation6 + $0xac] ss:$20 sps:$4 sm:$0xff]  }
 0x426   :  { %2102 = vmatprep.subr.bf16.mxu1 %v5712_v59  ;;  %v5752_v59 = vld [vmem:[#allocation6 + $0xb0] ss:$20 sps:$4 sm:$0xff]  }
 0x429   :  { %2103 = vmatpush1.bf16.msra.mxu1 %v5710_v60  ;;  %v5756_v60 = vld [vmem:[#allocation6 + $0x218] ss:$20 sps:$4 sm:$0xff]  }
 0x42a   :  { %2104 = vmatprep.subr.bf16.mxu1 %v5718_v61  ;;  %v5753_v61 = vld [vmem:[#allocation6 + $0xa8] ss:$20 sps:$4 sm:$0xff]  }
 0x42d   :  { %2105 = vmatpush1.bf16.msra.mxu1 %v5716_v62  ;;  %v5760_v62 = vld [vmem:[#allocation6 + $0xd4] ss:$20 sps:$4 sm:$0xff]  }
 0x42e   :  { %2106 = vmatprep.subr.bf16.mxu1 %v5724_v3  ;;  %v5758_v3 = vld [vmem:[#allocation6 + $0xd0] ss:$20 sps:$4 sm:$0xff]  }
 0x431   :  { %2107 = vmatpush1.bf16.msra.mxu1 %v5722_v4  ;;  %v5765_v4 = vld [vmem:[#allocation6 + $0xfc] ss:$20 sps:$4 sm:$0xff]  }
 0x432   :  { %2108 = vmatprep.subr.bf16.mxu1 %v5730_v8  ;;  %v5770_v8 = vld [vmem:[#allocation6 + $0x124] ss:$20 sps:$4 sm:$0xff]  }
 0x435   :  { %2109 = vmatpush1.bf16.msra.mxu1 %v5728_v7  ;;  %v5763_v7 = vld [vmem:[#allocation6 + $0xf8] ss:$20 sps:$4 sm:$0xff]  }
 0x436   :  { %2160 = vmatprep.subr.bf16.mxu1 %v5735_v12  ;;  %v5768_v12 = vld [vmem:[#allocation6 + $0x120] ss:$20 sps:$4 sm:$0xff]  }
 0x4cb   :  { %v1163_v40 = vpop.f32.mrb[8].mxu0  ;;  %v1234_v42 = vpop.f32.mrb[8].mxu1 }
 0x4cc   :  { %v1241_v44 = vrot.slane %v1163_v40, %v6400_v38  ;;  %v1249_v50 = vrot.slane %v1234_v42, %v6400_v38  ;;  %v1165_v51 = vpop.f32.mrb[9].mxu0  ;;  %v5092_v47 = vpop.f32.mrb[9].mxu1  ;;  %v5773_v40 = vld [vmem:[#allocation6 + $0x14c] ss:$20 sps:$4 sm:$0xff]  }
 0x4cd   :  { %v1245_v53 = vrot.slane %v1165_v51, %v6400_v38  ;;  %v6553_v42 = vld [vmem:[%s7296_s6] sm:$0xff]   ;;  %v6571_v47 = vld [vmem:[%s7296_s6 + $0x50] sm:$0xff]  }
 0x4ce   :  { %v1250_v55 = vmul.f32 %v1241_v44, %v6494_v19  ;;  %v1252_v56 = vmul.f32 %v1249_v50, %v6497_v20  ;;  %v5771_v44 = vld [vmem:[#allocation6 + $0x148] ss:$20 sps:$4 sm:$0xff]   ;;  %v5774_v51 = vld [vmem:[#allocation6 + $0x170] ss:$20 sps:$4 sm:$0xff]  }
 0x4cf   :  { %v1251_v57 = vmul.f32 %v1245_v53, %v6500_v21  ;;  %v5736_v21 = vld [vmem:[#allocation6 + $0x178] ss:$20 sps:$4 sm:$0xff]   ;;  %v5776_v50 = vld [vmem:[#allocation6 + $0x174] ss:$20 sps:$4 sm:$0xff]   ;;  %v5779_v53 = vld [vmem:[#allocation6 + $0x19c] ss:$20 sps:$4 sm:$0xff]  }
 0x4d0   :  { %v1269_v58 = vadd.f32 %v1257_v46, %v1250_v55  ;;  %v1271_v11 = vadd.f32 %v1265_v43, %v1252_v56  ;;  %v6558_v46 = vld [vmem:[%s7296_s6 + $0x48] sm:$0xff]   ;;  %v5782_v55 = vld [vmem:[#allocation6 + $0x1c4] ss:$20 sps:$4 sm:$0xff]  }
 0x4d1   :  { %v1270_v13 = vadd.f32 %v1261_v54, %v1251_v57  ;;  %v6566_v43 = vld [vmem:[%s7296_s6 + $0x8] sm:$0xff]  }
 0x4d2   :  { %vm1272_vm5 = vcmp.ge.f32.partialorder %v1269_v58, 0.0  ;;  %v1275_v14 = vmul.f32 0.01, %v1269_v58  ;;  %vm1274_vm6 = vcmp.ge.f32.partialorder %v1271_v11, 0.0  ;;  %v1277_v15 = vmul.f32 0.01, %v1271_v11 }
 0x4d3   :  { %vm1273_vm7 = vcmp.ge.f32.partialorder %v1270_v13, 0.0  ;;  %v1276_v16 = vmul.f32 0.01, %v1270_v13  ;;  %v5777_v54 = vld [vmem:[#allocation6 + $0x198] ss:$20 sps:$4 sm:$0xff]  }
 0x4d4   :  { %v1280_v17 = vsel %vm1274_vm6, %v1271_v11, %v1277_v15  ;;  %v1278_v22 = vsel %vm1272_vm5, %v1269_v58, %v1275_v14  ;;  %v5780_v56 = vld [vmem:[#allocation6 + $0x1c0] ss:$20 sps:$4 sm:$0xff]   ;;  %v5783_v58 = vld [vmem:[#allocation6 + $0x1e8] ss:$20 sps:$4 sm:$0xff]   ;;  %v5789_v15 = vld [vmem:[#allocation6 + $0x238] ss:$20 sps:$4 sm:$0xff]  }
 0x4d5   :  { %v6538_v23 = vpack.c.bf16 %v1280_v17, %v1280_v17  ;;  %v1279_v24 = vsel %vm1273_vm7, %v1270_v13, %v1276_v16  ;;  %v6541_v20 = vpack.c.bf16 %v1278_v22, %v1278_v22  ;;  %v5785_v57 = vld [vmem:[#allocation6 + $0x1ec] ss:$20 sps:$4 sm:$0xff]   ;;  %v5788_v11 = vld [vmem:[#allocation6 + $0x214] ss:$20 sps:$4 sm:$0xff]   ;;  %v5786_v13 = vld [vmem:[#allocation6 + $0x210] ss:$20 sps:$4 sm:$0xff]  }
 0x4d6   :  { %v1282_v19 = vpack.c.bf16 %v1279_v24, %v1279_v24  ;;  %v5791_v14 = vld [vmem:[#allocation6 + $0x23c] ss:$20 sps:$4 sm:$0xff]   ;;  %v5794_v16 = vld [vmem:[#allocation6 + $0x264] ss:$20 sps:$4 sm:$0xff]   ;;  %v5792_v17 = vld [vmem:[#allocation6 + $0x260] ss:$20 sps:$4 sm:$0xff]  }
 0x4d7   :  { %2152 = vmatmul.mubr.bf16.vlgmr.msra.gmra.mrb[12].mxu0 %v6538_v23  ;;  %v5795_v22 = vld [vmem:[#allocation6 + $0x288] ss:$20 sps:$4 sm:$0xff]  }
 0x4d8   :  { %4747 = vmatpush3.bf16.msra.mxu0 %v5732_v18  ;;  %2110 = vmatprep.mubr.bf16.mxu1 %v1282_v19  ;;  %v5797_v18 = vld [vmem:[#allocation6 + $0x28c] ss:$20 sps:$4 sm:$0xff]   ;;  %v5800_v24 = vld [vmem:[#allocation6 + $0x2b4] ss:$20 sps:$4 sm:$0xff]  }
 0x4d9   :  { %2274 = vmatprep.mubr.bf16.mxu0 %v1282_v19  ;;  %2111 = vmatmul.mubr.bf16.vlgmr.msra.gmra.mrb[12].mxu1 %v6541_v20 }
 0x4da   :  { %2161 = vmatpush1.bf16.msra.mxu1 %v5733_v25  ;;  %2192 = vmatprep.mubr.bf16.mxu1 %v1282_v19  ;;  %v5798_v19 = vld [vmem:[#allocation6 + $0x2b0] ss:$20 sps:$4 sm:$0xff]  }
 0x4db   :  { %4748 = vmatprep.subr.bf16.mxu0 %v5736_v21  ;;  %2162 = vmatprep.subr.bf16.mxu1 %v5740_v26  ;;  %v5803_v25 = vld [vmem:[#allocation6 + $0x2dc] ss:$20 sps:$4 sm:$0xff]   ;;  %v5801_v21 = vld [vmem:[#allocation6 + $0x2d8] ss:$20 sps:$4 sm:$0xff]  }
 0x4dc   :  { %4749 = vmatpush3.bf16.msra.mxu0 %v5737_v27  ;;  %v5806_v26 = vld [vmem:[#allocation6 + $0x304] ss:$20 sps:$4 sm:$0xff]   ;;  %v5804_v27 = vld [vmem:[#allocation6 + $0x300] ss:$20 sps:$4 sm:$0xff]  }
 0x4dd   :  { %4750 = vmatprep.subr.bf16.mxu0 %v5741_v28  ;;  %v5809_v28 = vld [vmem:[#allocation6 + $0x32c] ss:$20 sps:$4 sm:$0xff]  }
 0x4de   :  { %2163 = vmatpush1.bf16.msra.mxu1 %v5738_v29  ;;  %v5807_v29 = vld [vmem:[#allocation6 + $0x328] ss:$20 sps:$4 sm:$0xff]  }
 0x4df   :  { %2164 = vmatprep.subr.bf16.mxu1 %v5745_v30  ;;  %v5812_v30 = vld [vmem:[#allocation6 + $0x354] ss:$20 sps:$4 sm:$0xff]  }
 0x4e0   :  { %4751 = vmatpush3.bf16.msra.mxu0 %v5742_v31  ;;  %v6580_v31 = vld [vmem:[%s7296_s6 + $0x10] sm:$0xff]  }
 0x4e1   :  { %4752 = vmatprep.subr.bf16.mxu0 %v5746_v32  ;;  %v5815_v32 = vld [vmem:[#allocation6 + $0x37c] ss:$20 sps:$4 sm:$0xff]  }
 0x4e2   :  { %2165 = vmatpush1.bf16.msra.mxu1 %v5743_v33  ;;  %v6586_v33 = vld [vmem:[%s7296_s6 + $0x58] sm:$0xff]  }
 0x4e3   :  { %2166 = vmatprep.subr.bf16.mxu1 %v5750_v34  ;;  %v5813_v34 = vld [vmem:[#allocation6 + $0x378] ss:$20 sps:$4 sm:$0xff]  }
 0x4e4   :  { %4753 = vmatpush3.bf16.msra.mxu0 %v5747_v35  ;;  %v6592_v35 = vld [vmem:[%s7296_s6 + $0x18] sm:$0xff]  }
 0x4e5   :  { %4754 = vmatprep.subr.bf16.mxu0 %v5751_v48  ;;  %v5818_v48 = vld [vmem:[#allocation6 + $0x3a4] ss:$20 sps:$4 sm:$0xff]  }
 0x4e6   :  { %2167 = vmatpush1.bf16.msra.mxu1 %v5748_v49  ;;  %v6598_v49 = vld [vmem:[%s7296_s6 + $0x60] sm:$0xff]  }
 0x4e7   :  { %2168 = vmatprep.subr.bf16.mxu1 %v5755_v52  ;;  %v5816_v52 = vld [vmem:[#allocation6 + $0x3a0] ss:$20 sps:$4 sm:$0xff]  }
 0x4e8   :  { %4755 = vmatpush3.bf16.msra.mxu0 %v5752_v59  ;;  %v6604_v59 = vld [vmem:[%s7296_s6 + $0x20] sm:$0xff]  }
 0x4e9   :  { %4756 = vmatprep.subr.bf16.mxu0 %v5756_v60  ;;  %v6610_v60 = vld [vmem:[%s7296_s6 + $0x68] sm:$0xff]  }
 0x4ea   :  { %2169 = vmatpush1.bf16.msra.mxu1 %v5753_v61  ;;  %v5819_v61 = vld [vmem:[#allocation6 + $0x290] ss:$20 sps:$4 sm:$0xff]  }
 0x4eb   :  { %2170 = vmatprep.subr.bf16.mxu1 %v5760_v62  ;;  %v6616_v62 = vld [vmem:[%s7296_s6 + $0x28] sm:$0xff]  }
 0x4ec   :  { %4757 = vmatpush3.bf16.msra.mxu0 %v5757_v63  ;;  %v6624_v63 = vld [vmem:[%s7296_s6 + $0x70] sm:$0xff]  }
 0x4ed   :  { %4758 = vmatprep.subr.bf16.mxu0 %v5761_v2  ;;  %v6629_v2 = vld [vmem:[%s7296_s6 + $0x30] sm:$0xff]  }
 0x4ee   :  { %2171 = vmatpush1.bf16.msra.mxu1 %v5758_v3  ;;  %v5820_v3 = vld [vmem:[#allocation6 + $0x2b8] ss:$20 sps:$4 sm:$0xff]  }
 0x4ef   :  { %2172 = vmatprep.subr.bf16.mxu1 %v5765_v4  ;;  %v6636_v4 = vld [vmem:[%s7296_s6 + $0x78] sm:$0xff]  }
 0x4f0   :  { %4759 = vmatpush3.bf16.msra.mxu0 %v5762_v5  ;;  %v6645_v5 = vld [vmem:[%s7296_s6 + $0x38] sm:$0xff]  }
 0x4f1   :  { %4760 = vmatprep.subr.bf16.mxu0 %v5766_v6  ;;  %v5821_v6 = vld [vmem:[#allocation6 + $0x2e0] ss:$20 sps:$4 sm:$0xff]  }
 0x4f2   :  { %2173 = vmatpush1.bf16.msra.mxu1 %v5763_v7  ;;  %v5822_v7 = vld [vmem:[#allocation6 + $0x308] ss:$20 sps:$4 sm:$0xff]  }
 0x4f3   :  { %2174 = vmatprep.subr.bf16.mxu1 %v5770_v8  ;;  %v5823_v8 = vld [vmem:[#allocation6 + $0x330] ss:$20 sps:$4 sm:$0xff]  }
 0x4f4   :  { %4761 = vmatpush3.bf16.msra.mxu0 %v5767_v9  ;;  %v5824_v9 = vld [vmem:[#allocation6 + $0x358] ss:$20 sps:$4 sm:$0xff]  }
 0x4f5   :  { %5343 = vmatprep.subr.bf16.mxu0 %v6547_v36 }
 0x4f6   :  { %2175 = vmatpush1.bf16.msra.mxu1 %v5768_v12  ;;  %v5825_v12 = vld [vmem:[#allocation6 + $0x380] ss:$20 sps:$4 sm:$0xff]  }
 0x4f7   :  { %2275 = vmatmul.mubr.bf16.vlgmr.msra.gmra.mrb[16].mxu0 %v6541_v20  ;;  %2176 = vmatprep.subr.bf16.mxu1 %v5773_v40  ;;  %v5826_v40 = vld [vmem:[#allocation6 + $0x3a8] ss:$20 sps:$4 sm:$0xff]  }
 0x4f8   :  { %5345 = vmatpush3.bf16.msra.mxu0 %v6553_v42 }
 0x4f9   :  { %5347 = vmatprep.subr.bf16.mxu0 %v6558_v46 }
 0x4fa   :  { %2177 = vmatpush1.bf16.msra.mxu1 %v5771_v44  ;;  %v6658_v44 = vld [vmem:[%s7296_s6 + $0xc0] sm:$0xff]  }
 0x4fb   :  { %2178 = vmatprep.subr.bf16.mxu1 %v5776_v50  ;;  %v6664_v50 = vld [vmem:[%s7296_s6 + $0x80] sm:$0xff]  }
 0x4fc   :  { %5349 = vmatpush3.bf16.msra.mxu0 %v6566_v43 }
 0x4fd   :  { %5351 = vmatprep.subr.bf16.mxu0 %v6571_v47 }
 0x4fe   :  { %2179 = vmatpush1.bf16.msra.mxu1 %v5774_v51  ;;  %v6669_v51 = vld [vmem:[%s7296_s6 + $0xc8] sm:$0xff]  }
 0x4ff   :  { %2180 = vmatprep.subr.bf16.mxu1 %v5779_v53  ;;  %v6677_v53 = vld [vmem:[%s7296_s6 + $0x88] sm:$0xff]  }
 0x500   :  { %5353 = vmatpush3.bf16.msra.mxu0 %v6580_v31 }
 0x501   :  { %5355 = vmatprep.subr.bf16.mxu0 %v6586_v33 }
 0x502   :  { %2181 = vmatpush1.bf16.msra.mxu1 %v5777_v54  ;;  %v6682_v54 = vld [vmem:[%s7296_s6 + $0xd0] sm:$0xff]  }
 0x503   :  { %2182 = vmatprep.subr.bf16.mxu1 %v5782_v55  ;;  %v6694_v55 = vld [vmem:[%s7296_s6 + $0xd8] sm:$0xff]  }
 0x504   :  { %5357 = vmatpush3.bf16.msra.mxu0 %v6592_v35 }
 0x505   :  { %5359 = vmatprep.subr.bf16.mxu0 %v6598_v49 }
 0x506   :  { %2183 = vmatpush1.bf16.msra.mxu1 %v5780_v56  ;;  %v6701_v56 = vld [vmem:[%s7296_s6 + $0x98] sm:$0xff]  }
 0x507   :  { %2184 = vmatprep.subr.bf16.mxu1 %v5785_v57  ;;  %v6707_v57 = vld [vmem:[%s7296_s6 + $0xe0] sm:$0xff]  }
 0x508   :  { %5361 = vmatpush3.bf16.msra.mxu0 %v6604_v59 }
 0x509   :  { %5363 = vmatprep.subr.bf16.mxu0 %v6610_v60 }
 0x50a   :  { %2185 = vmatpush1.bf16.msra.mxu1 %v5783_v58  ;;  %v6713_v58 = vld [vmem:[%s7296_s6 + $0xa0] sm:$0xff]  }
 0x50b   :  { %2186 = vmatprep.subr.bf16.mxu1 %v5788_v11  ;;  %v6719_v11 = vld [vmem:[%s7296_s6 + $0xe8] sm:$0xff]  }
 0x50c   :  { %5365 = vmatpush3.bf16.msra.mxu0 %v6616_v62 }
 0x50d   :  { %5367 = vmatprep.subr.bf16.mxu0 %v6624_v63 }
 0x50e   :  { %2187 = vmatpush1.bf16.msra.mxu1 %v5786_v13  ;;  %v6725_v13 = vld [vmem:[%s7296_s6 + $0xa8] sm:$0xff]  }
 0x50f   :  { %2188 = vmatprep.subr.bf16.mxu1 %v5791_v14  ;;  %v6731_v14 = vld [vmem:[%s7296_s6 + $0xf0] sm:$0xff]  }
 0x510   :  { %5369 = vmatpush3.bf16.msra.mxu0 %v6629_v2 }
 0x511   :  { %5371 = vmatprep.subr.bf16.mxu0 %v6636_v4 }
 0x512   :  { %2189 = vmatpush1.bf16.msra.mxu1 %v5789_v15  ;;  %v6737_v15 = vld [vmem:[%s7296_s6 + $0xb0] sm:$0xff]  }
 0x513   :  { %2190 = vmatprep.subr.bf16.mxu1 %v5794_v16  ;;  %v6743_v16 = vld [vmem:[%s7296_s6 + $0xf8] sm:$0xff]  }
 0x514   :  { %5373 = vmatpush3.bf16.msra.mxu0 %v6645_v5 }
 0x515   :  { %5406 = vmatprep.subr.bf16.mxu0 %v7302_v0 }
 0x516   :  { %2191 = vmatpush1.bf16.msra.mxu1 %v5792_v17  ;;  %v6748_v17 = vld [vmem:[%s7296_s6 + $0xb8] sm:$0xff]  }
 0x517   :  { %2201 = vmatprep.subr.bf16.mxu1 %v5797_v18  ;;  %v6752_v18 = vld [vmem:[#allocation2 + $0x7] sm:$0x1f] }
 0x519   :  { %2193 = vmatmul.mubr.bf16.vlgmr.msra.gmra.mrb[16].mxu1 %v6541_v20  ;;  %v5810_v20 = vld [vmem:[#allocation6 + $0x350] ss:$20 sps:$4 sm:$0xff]  }
 0x51a   :  { %2202 = vmatpush1.bf16.msra.mxu1 %v5795_v22  ;;  %2233 = vmatprep.mubr.bf16.mxu1 %v7301_v10  ;;  %v1432_v22 = vrot.slane %v6752_v18, %v6400_v38 }
 0x51b   :  { %2203 = vmatprep.subr.bf16.mxu1 %v5800_v24 }
 0x51e   :  { %2204 = vmatpush1.bf16.msra.mxu1 %v5798_v19  ;;  %v1436_v19 = vrot.slane %v6752_v18, %v6406_v41 }
 0x51f   :  { %2205 = vmatprep.subr.bf16.mxu1 %v5803_v25 }
 0x522   :  { %2206 = vmatpush1.bf16.msra.mxu1 %v5801_v21 }
 0x523   :  { %2207 = vmatprep.subr.bf16.mxu1 %v5806_v26 }
 0x526   :  { %2208 = vmatpush1.bf16.msra.mxu1 %v5804_v27 }
 0x527   :  { %2209 = vmatprep.subr.bf16.mxu1 %v5809_v28 }
 0x52a   :  { %2210 = vmatpush1.bf16.msra.mxu1 %v5807_v29 }
 0x52b   :  { %2211 = vmatprep.subr.bf16.mxu1 %v5812_v30 }
 0x52e   :  { %2212 = vmatpush1.bf16.msra.mxu1 %v5810_v20 }
 0x52f   :  { %2213 = vmatprep.subr.bf16.mxu1 %v5815_v32 }
 0x532   :  { %2214 = vmatpush1.bf16.msra.mxu1 %v5813_v34 }
 0x533   :  { %2215 = vmatprep.subr.bf16.mxu1 %v5818_v48 }
 0x536   :  { %2216 = vmatpush1.bf16.msra.mxu1 %v5816_v52 }
 0x537   :  { %5093 = vmatprep.subr.bf16.mxu1 %v7304_v1 }
 0x539   :  { %2234 = vmatmul.mubr.bf16.vlgmr.msra.gmra.mrb[16].mxu1 %v6538_v23 }
 0x53a   :  { %5094 = vmatpush3.bf16.msra.mxu1 %v5819_v61  ;;  %5109 = vmatprep.mubr.msk.bf16.mxu1 %vm6093_vm0, %v7304_v1 }
 0x53b   :  { %5095 = vmatprep.subr.bf16.mxu1 %v7304_v1 }
 0x53e   :  { %5096 = vmatpush3.bf16.msra.mxu1 %v5820_v3 }
 0x53f   :  { %5097 = vmatprep.subr.bf16.mxu1 %v7304_v1 }
 0x542   :  { %5098 = vmatpush3.bf16.msra.mxu1 %v5821_v6 }
 0x543   :  { %5099 = vmatprep.subr.bf16.mxu1 %v7304_v1 }
 0x546   :  { %5100 = vmatpush3.bf16.msra.mxu1 %v5822_v7 }
 0x547   :  { %5101 = vmatprep.subr.bf16.mxu1 %v7304_v1 }
 0x54a   :  { %5102 = vmatpush3.bf16.msra.mxu1 %v5823_v8 }
 0x54b   :  { %5103 = vmatprep.subr.bf16.mxu1 %v7304_v1 }
 0x54e   :  { %5104 = vmatpush3.bf16.msra.mxu1 %v5824_v9 }
 0x54f   :  { %5105 = vmatprep.subr.bf16.mxu1 %v7304_v1 }
 0x552   :  { %5106 = vmatpush3.bf16.msra.mxu1 %v5825_v12 }
 0x553   :  { %5107 = vmatprep.subr.bf16.mxu1 %v7304_v1 }
 0x556   :  { %5108 = vmatpush3.bf16.msra.mxu1 %v5826_v40 }
 0x557   :  { %5375 = vmatprep.subr.bf16.mxu1 %v6658_v44 }
 0x559   :  { %5110 = vmatmul.mubr.bf16.vlgmr.msra.gmra.mrb[20].mxu1 %v6538_v23  ;;  %v6689_v23 = vld [vmem:[%s7296_s6 + $0x90] sm:$0xff]  }
 0x55a   :  { %5377 = vmatpush3.bf16.msra.mxu1 %v6664_v50 }
 0x55b   :  { %5379 = vmatprep.subr.bf16.mxu1 %v6669_v51 }
 0x55e   :  { %5381 = vmatpush3.bf16.msra.mxu1 %v6677_v53 }
 0x55f   :  { %5383 = vmatprep.subr.bf16.mxu1 %v6682_v54 }
 0x562   :  { %5385 = vmatpush3.bf16.msra.mxu1 %v6689_v23 }
 0x563   :  { %5387 = vmatprep.subr.bf16.mxu1 %v6694_v55 }
 0x566   :  { %5389 = vmatpush3.bf16.msra.mxu1 %v6701_v56 }
 0x567   :  { %5391 = vmatprep.subr.bf16.mxu1 %v6707_v57 }
 0x56a   :  { %5393 = vmatpush3.bf16.msra.mxu1 %v6713_v58 }
 0x56b   :  { %5395 = vmatprep.subr.bf16.mxu1 %v6719_v11 }
 0x56e   :  { %5397 = vmatpush3.bf16.msra.mxu1 %v6725_v13 }
 0x56f   :  { %5399 = vmatprep.subr.bf16.mxu1 %v6731_v14 }
 0x572   :  { %5401 = vmatpush3.bf16.msra.mxu1 %v6737_v15 }
 0x573   :  { %5403 = vmatprep.subr.bf16.mxu1 %v6743_v16 }
 0x576   :  { %5405 = vmatpush3.bf16.msra.mxu1 %v6748_v17 }
 0x5aa   :  { %v2153_v24 = vpop.f32.mrb[12].mxu0 }
 0x5ab   :  { %v2155_v25 = vpop.f32.mrb[13].mxu0 }
 0x5ac   :  { %v2112_v21 = vpop.f32.mrb[12].mxu1  ;;  %v2157_v26 = vpop.f32.mrb[14].mxu0 }
 0x5ad   :  { %v2113_v27 = vadd.f32 %v2112_v21, %v1432_v22  ;;  %v2114_v28 = vpop.f32.mrb[13].mxu1  ;;  %v2158_v29 = vpop.f32.mrb[15].mxu0 }
 0x5ae   :  { %v2115_v30 = vadd.f32 %v2114_v28, %v1436_v19  ;;  %v2116_v20 = vpop.f32.mrb[14].mxu1  ;;  %v6785_v28 = vld [vmem:[%s7296_s6 + $0x110] sm:$0xff]  }
 0x5af   :  { %v6758_v32 = vadd.f32 %v2153_v24, %v2113_v27  ;;  %v2117_v34 = vpop.f32.mrb[15].mxu1  ;;  %v6778_v27 = vld [vmem:[%s7296_s6 + $0x108] sm:$0xff]   ;;  %v6792_v20 = vld [vmem:[%s7296_s6 + $0x118] sm:$0xff]  }
 0x5b0   :  { %v6760_v48 = vadd.f32 %v2155_v25, %v2115_v30  ;;  %v6769_v25 = vld [vmem:[%s7296_s6 + $0x100] sm:$0xff]  }
 0x5b1   :  { %v2322_v52 = vmul.f32 %v6413_v45, %v6758_v32 }
 0x5b2   :  { %v2323_v61 = vmul.f32 %v6413_v45, %v6760_v48 }
 0x5b3   :  { %v2327_v3 = vrot.slane %v2322_v52, 4 }
 0x5b4   :  { %v2333_v6 = vrot.slane %v2323_v61, 4 }
 0x5b5   :  { %v2328_v7 = vadd.f32 %v2327_v3, %v2322_v52  ;;  %v6799_v3 = vld [vmem:[%s7296_s6 + $0x120] sm:$0xff]  }
 0x5b6   :  { %v2334_v8 = vadd.f32 %v2333_v6, %v2323_v61  ;;  %v6806_v6 = vld [vmem:[%s7296_s6 + $0x128] sm:$0xff]  }
 0x5b7   :  { %v2329_v9 = vrot.slane %v2328_v7, 2 }
 0x5b8   :  { %v2335_v12 = vrot.slane %v2334_v8, 2 }
 0x5b9   :  { %v2330_v40 = vadd.f32 %v2329_v9, %v2328_v7  ;;  %v6813_v7 = vld [vmem:[%s7296_s6 + $0x130] sm:$0xff]   ;;  %v7306_v9 = vsub.s32 3, %v6397_v37 }
 0x5ba   :  { %v2336_v22 = vadd.f32 %v2335_v12, %v2334_v8  ;;  %v6820_v8 = vld [vmem:[%s7296_s6 + $0x138] sm:$0xff]   ;;  %v1440_v12 = vrot.slane %v6752_v18, %v6403_v39 }
 0x5bb   :  { %v2331_v19 = vrot.slane %v2330_v40, 1  ;;  %7313 = vst [vmem:[#allocation15_spill] sm:$0xff] %v6820_v8 }
 0x5bc   :  { %v2337_v24 = vrot.slane %v2336_v22, 1 }
 0x5bd   :  { %v2332_v26 = vadd.f32 %v2331_v19, %v2330_v40  ;;  %v1444_v40 = vrot.slane %v6752_v18, %v7306_v9 }
 0x5be   :  { %v2338_v21 = vadd.f32 %v2337_v24, %v2336_v22 }
 0x5c0   :  { %2421 = vmatprep.mubr.f32.mxu0 %v2338_v21 }
 0x5c1   :  { %2422 = vmatmul.mubr.f32.vlgmr.msra.gmra.mrb[10].mxu0 %v2332_v26 }
 0x5c2   :  { %5408 = vmatpush3.bf16.msra.mxu0 %v6769_v25  ;;  %5145 = vmatprep.mubr.msk.f32.mxu0 %vm6093_vm0, %v7304_v1 }
 0x5c3   :  { %5409 = vmatprep.subr.bf16.mxu0 %v7302_v0 }
 0x5c6   :  { %5411 = vmatpush3.bf16.msra.mxu0 %v6778_v27 }
 0x5c7   :  { %5412 = vmatprep.subr.bf16.mxu0 %v7302_v0 }
 0x5ca   :  { %v4762_v29 = vpop.f32.mrb[16].mxu0  ;;  %5414 = vmatpush3.bf16.msra.mxu0 %v6785_v28 }
 0x5cb   :  { %v4763_v30 = vpop.f32.mrb[17].mxu0  ;;  %5415 = vmatprep.subr.bf16.mxu0 %v7302_v0 }
 0x5cc   :  { %v4764_v34 = vadd.f32 %v4763_v30, %v4762_v29  ;;  %v4765_v52 = vpop.f32.mrb[18].mxu0 }
 0x5cd   :  { %v4766_v61 = vpop.f32.mrb[19].mxu0 }
 0x5ce   :  { %5417 = vmatpush3.bf16.msra.mxu0 %v6792_v20 }
 0x5cf   :  { %5418 = vmatprep.subr.bf16.mxu0 %v7302_v0 }
 0x5d2   :  { %5420 = vmatpush3.bf16.msra.mxu0 %v6799_v3 }
 0x5d3   :  { %5421 = vmatprep.subr.bf16.mxu0 %v7302_v0 }
 0x5d6   :  { %5423 = vmatpush3.bf16.msra.mxu0 %v6806_v6 }
 0x5d7   :  { %5424 = vmatprep.subr.bf16.mxu0 %v7302_v0 }
 0x5da   :  { %5426 = vmatpush3.bf16.msra.mxu0 %v6813_v7 }
 0x5db   :  { %5427 = vmatprep.subr.bf16.mxu0 %v7302_v0 }
 0x5de   :  { %5429 = vmatpush3.bf16.msra.mxu0 %v6820_v8 }
 0x5df   :  { %5485 = vmatprep.subr.bf16.mxu0 %v6658_v44 }
 0x60c   :  { %v2235_v22 = vpop.f32.mrb[16].mxu1 }
 0x60d   :  { %v6830_v19 = vadd.f32 %v2235_v22, %v1440_v12  ;;  %v2237_v24 = vpop.f32.mrb[17].mxu1 }
 0x60e   :  { %v6832_v21 = vadd.f32 %v2237_v24, %v1444_v40  ;;  %v2239_v26 = vpop.f32.mrb[18].mxu1 }
 0x60f   :  { %v2324_v29 = vmul.f32 %v6830_v19, %v6413_v45  ;;  %v2240_v44 = vpop.f32.mrb[19].mxu1  ;;  %v7314_v26 = vmov 0.0  }
 0x610   :  { %v2325_v30 = vmul.f32 %v6832_v21, %v6413_v45  ;;  %v1447_v44 = vsub.s32 4, %v6397_v37 }
 0x611   :  { %v2339_v52 = vrot.slane %v2324_v29, 4 }
 0x612   :  { %v2345_v61 = vrot.slane %v2325_v30, 4  ;;  %v1448_v8 = vrot.slane %v6752_v18, %v1447_v44 }
 0x613   :  { %v2340_v10 = vadd.f32 %v2339_v52, %v2324_v29 }
 0x614   :  { %v2346_v0 = vadd.f32 %v2345_v61, %v2325_v30  ;;  %v2277_v29 = vadd.f32 %v4764_v34, %v1448_v8 }
 0x615   :  { %v2341_v1 = vrot.slane %v2340_v10, 2 }
 0x616   :  { %v2347_v9 = vrot.slane %v2346_v0, 2 }
 0x617   :  { %v2342_v39 = vadd.f32 %v2341_v1, %v2340_v10 }
 0x618   :  { %v2348_v12 = vadd.f32 %v2347_v9, %v2346_v0 }
 0x619   :  { %v2343_v22 = vrot.slane %v2342_v39, 1 }
 0x61a   :  { %v2349_v41 = vrot.slane %v2348_v12, 1 }
 0x61b   :  { %v2344_v24 = vadd.f32 %v2343_v22, %v2342_v39 }
 0x61c   :  { %v2350_v40 = vadd.f32 %v2349_v41, %v2348_v12 }
 0x61e   :  { %2491 = vmatprep.mubr.f32.mxu1 %v2350_v40 }
 0x61f   :  { %2492 = vmatmul.mubr.f32.vlgmr.msra.gmra.mrb[10].mxu1 %v2344_v24  ;;  %v6882_v24 = vld [vmem:[#allocation7 + $0x8] ss:$20 sps:$4 sm:$0xff]  }
 0x620   :  { %2636 = vmatprep.mubr.f32.mxu1 %v7314_v26 }
 0x62c   :  { %v2316_v30 = vpop.f32.mrb[20].mxu1 }
 0x62d   :  { %v6843_v52 = vadd.f32 %v2316_v30, %v2277_v29  ;;  %v5111_v1 = vpop.f32.mrb[21].mxu1  ;;  %v6884_v30 = vld [vmem:[#allocation7 + $0x34] ss:$20 sps:$4 sm:$0xff]  }
 0x62e   :  { %v2319_v0 = vpop.f32.mrb[22].mxu1  ;;  %v6886_v1 = vld [vmem:[#allocation7 + $0x58] sm:$0xff] }
 0x62f   :  { %v2326_v41 = vmul.f32 %v6413_v45, %v6843_v52  ;;  %v5112_v39 = vpop.f32.mrb[23].mxu1  ;;  %v6890_v0 = vld [vmem:[#allocation7 + $0x30] ss:$20 sps:$4 sm:$0xff]  }
 0x630   :  { %v418_v39 = vunpack.c.l.bf16 %v6886_v1 }
 0x631   :  { %v2351_v10 = vrot.slane %v2326_v41, 4 }
 0x633   :  { %v2352_v9 = vadd.f32 %v2351_v10, %v2326_v41  ;;  %v419_v41 = vunpack.c.h.bf16 %v6886_v1  ;;  %v6899_v10 = vld [vmem:[#allocation7 + $0x10] ss:$20 sps:$4 sm:$0xff]  }
 0x634   :  { %v5846_v1 = vld [vmem:[%s7298_s8 + $0x14] ss:$8 sps:$4 sm:$0xff]  }
 0x635   :  { %v2353_v61 = vrot.slane %v2352_v9, 2 }
 0x637   :  { %v2354_v12 = vadd.f32 %v2353_v61, %v2352_v9  ;;  %v7315_v9 = vmov 0.0|0.0   ;;  %v6906_v61 = vld [vmem:[#allocation7 + $0x38] ss:$20 sps:$4 sm:$0xff]  }
 0x639   :  { %v2355_v22 = vrot.slane %v2354_v12, 1 }
 0x63b   :  { %v2356_v40 = vadd.f32 %v2355_v22, %v2354_v12  ;;  %v6911_v12 = vld [vmem:[#allocation7 + $0x60] sm:$0xf] }
 0x63c   :  { %v420_v22 = vunpack.c.l.bf16 %v6911_v12  ;;  %v5858_v12 = vld [vmem:[%s7298_s8 + $0x54] ss:$8 sps:$4 sm:$0xff]  }
 0x63d   :  { %5146 = vmatmul.mubr.f32.vlgmr.msra.gmra.mrb[20].mxu0 %v2356_v40 }
 0x63e   :  { %5487 = vmatpush3.bf16.msra.mxu0 %v6664_v50  ;;  %v5827_v50 = vld [vmem:[#allocation7 + $0x4] ss:$20 sps:$4 sm:$0xff]  }
 0x63f   :  { %5489 = vmatprep.subr.bf16.mxu0 %v6669_v51  ;;  %v6862_v51 = vld [vmem:[#allocation7] ss:$20 sps:$4 sm:$0xff]   ;;  %5431 = vmatprep.subr.bf16.mxu1 %v5827_v50 }
 0x640   :  { %5433 = vmatpush1.bf16.msra.mxu1 %v6862_v51 }
 0x642   :  { %5491 = vmatpush3.bf16.msra.mxu0 %v6677_v53  ;;  %v6864_v53 = vld [vmem:[#allocation7 + $0x2c] ss:$20 sps:$4 sm:$0xff]  }
 0x643   :  { %5493 = vmatprep.subr.bf16.mxu0 %v6682_v54  ;;  %v6867_v54 = vld [vmem:[#allocation7 + $0x28] ss:$20 sps:$4 sm:$0xff]   ;;  %5435 = vmatprep.subr.bf16.mxu1 %v6864_v53 }
 0x644   :  { %5437 = vmatpush1.bf16.msra.mxu1 %v6867_v54 }
 0x646   :  { %5495 = vmatpush3.bf16.msra.mxu0 %v6689_v23  ;;  %v6871_v23 = vld [vmem:[#allocation7 + $0x50] sm:$0xff] }
 0x647   :  { %5497 = vmatprep.subr.bf16.mxu0 %v6694_v55  ;;  %v417_v55 = vunpack.c.h.bf16 %v6871_v23 }
 0x649   :  { %2580 = vmatprep.subr.mxu1 %v417_v55 }
 0x64a   :  { %5499 = vmatpush3.bf16.msra.mxu0 %v6701_v56  ;;  %v416_v56 = vunpack.c.l.bf16 %v6871_v23 }
 0x64b   :  { %5501 = vmatprep.subr.bf16.mxu0 %v6707_v57  ;;  %v6877_v57 = vld [vmem:[#allocation7 + $0xc] ss:$20 sps:$4 sm:$0xff]  }
 0x64c   :  { %2581 = vmatpush1.msra.mxu1 %v416_v56 }
 0x64d   :  { %5439 = vmatprep.subr.bf16.mxu1 %v6877_v57 }
 0x64e   :  { %5503 = vmatpush3.bf16.msra.mxu0 %v6713_v58 }
 0x64f   :  { %5505 = vmatprep.subr.bf16.mxu0 %v6719_v11 }
 0x652   :  { %5507 = vmatpush3.bf16.msra.mxu0 %v6725_v13 }
 0x653   :  { %5509 = vmatprep.subr.bf16.mxu0 %v6731_v14 }
 0x656   :  { %5511 = vmatpush3.bf16.msra.mxu0 %v6737_v15 }
 0x657   :  { %5513 = vmatprep.subr.bf16.mxu0 %v6743_v16 }
 0x65a   :  { %5515 = vmatpush3.bf16.msra.mxu0 %v6748_v17 }
 0x65b   :  { %5541 = vmatprep.subr.bf16.mxu0 %v5827_v50 }
 0x694   :  { %v4809_v58 = vpop.f32.mrb[10].mxu0 }
 0x695   :  { %v4810_v11 = vpop.f32.mrb[11].mxu0 }
 0x696   :  { %v4811_v13 = vadd.f32 %v4810_v11, %v4809_v58 }
 0x6f2   :  { %v4844_v14 = vpop.f32.mrb[10].mxu1 }
 0x6f3   :  { %v4845_v15 = vpop.f32.mrb[11].mxu1 }
 0x6f4   :  { %v4846_v16 = vadd.f32 %v4845_v15, %v4844_v14 }
 0x6f6   :  { %v2494_v17 = vadd.f32 %v4846_v16, %v4811_v13 }
 0x710   :  { %v2563_v18 = vpop.f32.mrb[20].mxu0 }
 0x711   :  { %v2564_v34 = vadd.f32 %v2563_v18, %v2494_v17  ;;  %v5147_v8 = vpop.f32.mrb[21].mxu0 }
 0x713   :  { %v2567_v29 = vmul.f32 0.03846154, %v2564_v34 }
 0x715   :  { %4226 = vmatmul.mubr.msk.f32.vlgmr.msra.gmra.mrb[24].mxu1 %vm2568_vm8, %v2567_v29 }
 0x716   :  { %5441 = vmatpush1.bf16.msra.mxu1 %v6882_v24  ;;  %2707 = vmatprep.mubr.f32.mxu1 %v7314_v26 }
 0x717   :  { %5443 = vmatprep.subr.bf16.mxu1 %v6884_v30 }
 0x71a   :  { %5445 = vmatpush1.bf16.msra.mxu1 %v6890_v0 }
 0x71b   :  { %2651 = vmatprep.subr.mxu1 %v419_v41 }
 0x71e   :  { %2652 = vmatpush1.msra.mxu1 %v418_v39 }
 0x71f   :  { %4227 = vmatmul.mubr.msk.f32.vlgmr.msra.gmra.mrb[26].mxu1 %vm2568_vm8, %v2567_v29  ;;  %5446 = vmatprep.subr.bf16.mxu1 %v7315_v9 }
 0x720   :  { %5448 = vmatpush3.bf16.msra.mxu1 %v6899_v10  ;;  %5158 = vmatprep.mubr.msk.f32.mxu1 %vm6093_vm0, %v7314_v26 }
 0x721   :  { %5449 = vmatprep.subr.bf16.mxu1 %v7315_v9 }
 0x724   :  { %5451 = vmatpush3.bf16.msra.mxu1 %v6906_v61 }
 0x725   :  { %5156 = vmatprep.subr.mxu1 %v7314_v26 }
 0x728   :  { %5157 = vmatpush3.msra.mxu1 %v420_v22 }
 0x729   :  { %5159 = vmatmul.mubr.msk.f32.vlgmr.msra.gmra.mrb[28].mxu1 %vm2568_vm8, %v2567_v29  ;;  %5453 = vmatprep.subr.bf16.mxu1 %v6547_v36 }
 0x72a   :  { %5455 = vmatpush3.bf16.msra.mxu1 %v6553_v42 }
 0x72b   :  { %5457 = vmatprep.subr.bf16.mxu1 %v6558_v46 }
 0x72e   :  { %5459 = vmatpush3.bf16.msra.mxu1 %v6566_v43 }
 0x72f   :  { %5461 = vmatprep.subr.bf16.mxu1 %v6571_v47 }
 0x732   :  { %5463 = vmatpush3.bf16.msra.mxu1 %v6580_v31 }
 0x733   :  { %5465 = vmatprep.subr.bf16.mxu1 %v6586_v33 }
 0x736   :  { %5467 = vmatpush3.bf16.msra.mxu1 %v6592_v35 }
 0x737   :  { %5469 = vmatprep.subr.bf16.mxu1 %v6598_v49 }
 0x73a   :  { %5471 = vmatpush3.bf16.msra.mxu1 %v6604_v59 }
 0x73b   :  { %5473 = vmatprep.subr.bf16.mxu1 %v6610_v60 }
 0x73e   :  { %5475 = vmatpush3.bf16.msra.mxu1 %v6616_v62 }
 0x73f   :  { %5477 = vmatprep.subr.bf16.mxu1 %v6624_v63 }
 0x742   :  { %5479 = vmatpush3.bf16.msra.mxu1 %v6629_v2 }
 0x743   :  { %5481 = vmatprep.subr.bf16.mxu1 %v6636_v4 }
 0x746   :  { %5483 = vmatpush3.bf16.msra.mxu1 %v6645_v5 }
 0x747   :  { %5516 = vmatprep.subr.bf16.mxu1 %v7315_v9 }
 0x7e8   :  { %v2638_v36 = vpop.f32.mrb[24].mxu1 }
 0x7e9   :  { %v2787_v42 = vrot.slane %v2638_v36, %v6400_v38  ;;  %v2640_v46 = vpop.f32.mrb[25].mxu1 }
 0x7ea   :  { %v2791_v43 = vrot.slane %v2640_v46, %v6400_v38 }
 0x7eb   :  { %v6939_v47 = vsub.f32 %v6758_v32, %v2787_v42 }
 0x7ec   :  { %v6942_v31 = vsub.f32 %v6760_v48, %v2791_v43 }
 0x7ed   :  { %v2809_v33 = vmul.f32 %v6939_v47, %v6939_v47 }
 0x7ee   :  { %v2810_v35 = vmul.f32 %v6942_v31, %v6942_v31 }
 0x7ef   :  { %v2814_v49 = vmul.f32 %v6413_v45, %v2809_v33 }
 0x7f0   :  { %v2815_v59 = vmul.f32 %v6413_v45, %v2810_v35 }
 0x7f1   :  { %v2819_v60 = vrot.slane %v2814_v49, 4 }
 0x7f2   :  { %v2825_v62 = vrot.slane %v2815_v59, 4  ;;  %v2709_v63 = vpop.f32.mrb[26].mxu1 }
 0x7f3   :  { %v2820_v2 = vadd.f32 %v2819_v60, %v2814_v49  ;;  %v2795_v4 = vrot.slane %v2709_v63, %v6400_v38  ;;  %v2711_v5 = vpop.f32.mrb[27].mxu1 }
 0x7f4   :  { %v2799_v32 = vrot.slane %v2711_v5, %v6400_v38  ;;  %v2826_v48 = vadd.f32 %v2825_v62, %v2815_v59 }
 0x7f5   :  { %v2821_v40 = vrot.slane %v2820_v2, 2  ;;  %v6953_v50 = vsub.f32 %v6830_v19, %v2795_v4 }
 0x7f6   :  { %v6956_v58 = vsub.f32 %v6832_v21, %v2799_v32  ;;  %v2827_v11 = vrot.slane %v2826_v48, 2 }
 0x7f7   :  { %v2811_v13 = vmul.f32 %v6953_v50, %v6953_v50  ;;  %v2822_v14 = vadd.f32 %v2821_v40, %v2820_v2 }
 0x7f8   :  { %v2812_v15 = vmul.f32 %v6956_v58, %v6956_v58  ;;  %v2828_v16 = vadd.f32 %v2827_v11, %v2826_v48 }
 0x7f9   :  { %v2816_v17 = vmul.f32 %v6413_v45, %v2811_v13  ;;  %v2823_v18 = vrot.slane %v2822_v14, 1 }
 0x7fa   :  { %v2817_v34 = vmul.f32 %v6413_v45, %v2812_v15  ;;  %v2829_v8 = vrot.slane %v2828_v16, 1 }
 0x7fb   :  { %v2831_v19 = vrot.slane %v2816_v17, 4  ;;  %v2824_v33 = vadd.f32 %v2823_v18, %v2822_v14  ;;  %v5861_v18 = vld [vmem:[%s7298_s8 + $0x64] ss:$8 sps:$4 sm:$0xff]  }
 0x7fc   :  { %v2837_v29 = vrot.slane %v2817_v34, 4  ;;  %v2780_v36 = vpop.f32.mrb[28].mxu1  ;;  %v2830_v21 = vadd.f32 %v2829_v8, %v2828_v16  ;;  %v5864_v8 = vld [vmem:[%s7298_s8 + $0x74] ss:$8 sps:$4 sm:$0xff]  }
 0x7fd   :  { %v2832_v42 = vadd.f32 %v2831_v19, %v2816_v17  ;;  %v2803_v46 = vrot.slane %v2780_v36, %v6400_v38  ;;  %v5160_v43 = vpop.f32.mrb[29].mxu1  ;;  %v5862_v19 = vld [vmem:[%s7298_s8 + $0x70] ss:$8 sps:$4 sm:$0xff]   ;;  %v5865_v36 = vld [vmem:[%s7298_s8 + $0x80] ss:$8 sps:$4 sm:$0xff]  }
 0x7fe   :  { %2913 = vmatprep.mubr.f32.mxu1 %v2830_v21  ;;  %v2838_v35 = vadd.f32 %v2837_v29, %v2817_v34  ;;  %v5859_v34 = vld [vmem:[%s7298_s8 + $0x60] ss:$8 sps:$4 sm:$0xff]   ;;  %v5867_v29 = vld [vmem:[%s7298_s8 + $0x84] ss:$8 sps:$4 sm:$0xff]   ;;  %v5870_v21 = vld [vmem:[%s7298_s8 + $0x94] ss:$8 sps:$4 sm:$0xff]  }
 0x7ff   :  { %v2833_v49 = vrot.slane %v2832_v42, 2  ;;  %v6966_v59 = vsub.f32 %v6843_v52, %v2803_v46  ;;  %2914 = vmatmul.mubr.f32.vlgmr.msra.gmra.mrb[30].mxu1 %v2824_v33  ;;  %v5873_v46 = vld [vmem:[%s7298_s8 + $0xa4] ss:$8 sps:$4 sm:$0xff]   ;;  %v5871_v43 = vld [vmem:[%s7298_s8 + $0xa0] ss:$8 sps:$4 sm:$0xff]  }
 0x800   :  { %5518 = vmatpush3.bf16.msra.mxu1 %v6769_v25  ;;  %v2839_v60 = vrot.slane %v2838_v35, 2  ;;  %5193 = vmatprep.mubr.msk.f32.mxu1 %vm6093_vm0, %v7314_v26  ;;  %v5876_v33 = vld [vmem:[%s7298_s8 + $0xb4] ss:$8 sps:$4 sm:$0xff]  }
 0x801   :  { %v2813_v62 = vmul.f32 %v6966_v59, %v6966_v59  ;;  %5519 = vmatprep.subr.bf16.mxu1 %v7315_v9  ;;  %v2834_v63 = vadd.f32 %v2833_v49, %v2832_v42  ;;  %v5868_v42 = vld [vmem:[%s7298_s8 + $0x90] ss:$8 sps:$4 sm:$0xff]   ;;  %v5879_v49 = vld [vmem:[%s7298_s8 + $0xc4] ss:$8 sps:$4 sm:$0xff]  }
 0x802   :  { %v2840_v2 = vadd.f32 %v2839_v60, %v2838_v35  ;;  %v5874_v35 = vld [vmem:[%s7298_s8 + $0xb0] ss:$8 sps:$4 sm:$0xff]   ;;  %v5877_v60 = vld [vmem:[%s7298_s8 + $0xc0] ss:$8 sps:$4 sm:$0xff]  }
 0x803   :  { %v2835_v4 = vrot.slane %v2834_v63, 1  ;;  %v2818_v52 = vmul.f32 %v6413_v45, %v2813_v62  ;;  %v5882_v62 = vld [vmem:[%s7298_s8 + $0xd4] ss:$8 sps:$4 sm:$0xff]  }
 0x804   :  { %5521 = vmatpush3.bf16.msra.mxu1 %v6778_v27  ;;  %v2841_v5 = vrot.slane %v2840_v2, 1 }
 0x805   :  { %5522 = vmatprep.subr.bf16.mxu1 %v7315_v9  ;;  %v2836_v32 = vadd.f32 %v2835_v4, %v2834_v63  ;;  %v2843_v48 = vrot.slane %v2818_v52, 4  ;;  %v5880_v63 = vld [vmem:[%s7298_s8 + $0xd0] ss:$8 sps:$4 sm:$0xff]   ;;  %v5883_v4 = vld [vmem:[%s7298_s8 + $0xe0] ss:$8 sps:$4 sm:$0xff]  }
 0x806   :  { %v2842_v25 = vadd.f32 %v2841_v5, %v2840_v2  ;;  %v5885_v2 = vld [vmem:[%s7298_s8 + $0xe4] ss:$8 sps:$4 sm:$0xff]   ;;  %v5888_v5 = vld [vmem:[%s7298_s8 + $0xf4] ss:$8 sps:$4 sm:$0xff]  }
 0x807   :  { %v2844_v45 = vadd.f32 %v2843_v48, %v2818_v52  ;;  %v5886_v52 = vld [vmem:[%s7298_s8 + $0xf0] ss:$8 sps:$4 sm:$0xff]   ;;  %v3991_v48 = vld [vmem:[#allocation9 + $0x88] sm:$0xff] }
 0x808   :  { %2983 = vmatprep.mubr.f32.mxu0 %v2842_v25  ;;  %5524 = vmatpush3.bf16.msra.mxu1 %v6785_v28  ;;  %v5891_v25 = vld [vmem:[%s7298_s8 + $0x104] ss:$8 sps:$4 sm:$0xff]  }
 0x809   :  { %2984 = vmatmul.mubr.f32.vlgmr.msra.gmra.mrb[22].mxu0 %v2836_v32  ;;  %5525 = vmatprep.subr.bf16.mxu1 %v7315_v9  ;;  %v2845_v27 = vrot.slane %v2844_v45, 2  ;;  %v3990_v32 = vld [vmem:[#allocation9 + $0x80] sm:$0xff] }
 0x80a   :  { %5543 = vmatpush1.bf16.msra.mxu0 %v6862_v51  ;;  %3130 = vmatprep.mubr.f32.mxu0 %v7314_v26  ;;  %v7316_v51 = vld [vmem:[#allocation15_spill] sm:$0xff] }
 0x80b   :  { %5545 = vmatprep.subr.bf16.mxu0 %v6864_v53  ;;  %v2846_v28 = vadd.f32 %v2845_v27, %v2844_v45  ;;  %v3974_v45 = vld [vmem:[#allocation9] sm:$0xff]  ;;  %v5562_v27 = vpack.c.bf16 %v3991_v48, %v3990_v32 }
 0x80c   :  { %5527 = vmatpush3.bf16.msra.mxu1 %v6792_v20 }
 0x80d   :  { %5528 = vmatprep.subr.bf16.mxu1 %v7315_v9  ;;  %v2847_v20 = vrot.slane %v2846_v28, 1 }
 0x80e   :  { %5547 = vmatpush1.bf16.msra.mxu0 %v6867_v54 }
 0x80f   :  { %3074 = vmatprep.subr.mxu0 %v417_v55 }
 0x810   :  { %5530 = vmatpush3.bf16.msra.mxu1 %v6799_v3  ;;  %v2848_v3 = vadd.f32 %v2847_v20, %v2846_v28  ;;  %v3975_v28 = vld [vmem:[#allocation9 + $0x8] sm:$0xff]  ;;  %v3992_v20 = vld [vmem:[#allocation9 + $0x90] sm:$0xff] }
 0x811   :  { %5531 = vmatprep.subr.bf16.mxu1 %v7315_v9 }
 0x812   :  { %3075 = vmatpush1.msra.mxu0 %v416_v56 }
 0x813   :  { %5549 = vmatprep.subr.bf16.mxu0 %v6877_v57 }
 0x814   :  { %5533 = vmatpush3.bf16.msra.mxu1 %v6806_v6 }
 0x815   :  { %5534 = vmatprep.subr.bf16.mxu1 %v7315_v9 }
 0x818   :  { %5536 = vmatpush3.bf16.msra.mxu1 %v6813_v7  ;;  %v107_v7 = vld [vmem:[#allocation2 + $0x11] sm:$0x1] }
 0x819   :  { %5537 = vmatprep.subr.bf16.mxu1 %v7315_v9 }
 0x81c   :  { %5539 = vmatpush3.bf16.msra.mxu1 %v7316_v51  ;;  %v3993_v51 = vld [vmem:[#allocation9 + $0x98] sm:$0xff] }
 0x81d   :  { %5563 = vmatprep.subr.bf16.mxu1 %v5562_v27 }
 0x81f   :  { %5194 = vmatmul.mubr.f32.vlgmr.msra.gmra.mrb[32].mxu1 %v2848_v3  ;;  %v5564_v3 = vpack.c.bf16 %v3975_v28, %v3974_v45  ;;  %v7319_v45 = vsub.s32 3, %v6397_v37  ;;  %v5901_v37 = vld [vmem:[%s7298_s8 + $0x140] ss:$8 sps:$4 sm:$0xff]  }
 0x821   :  { %5565 = vmatpush3.bf16.msra.mxu1 %v5564_v3 }
 0x8d2   :  { %v4902_v53 = vpop.f32.mrb[30].mxu1 }
 0x8d3   :  { %v4903_v54 = vpop.f32.mrb[31].mxu1 }
 0x8d4   :  { %v4904_v23 = vadd.f32 %v4903_v54, %v4902_v53  ;;  %v5566_v53 = vpack.c.bf16 %v3993_v51, %v3992_v20  ;;  %v3976_v54 = vld [vmem:[#allocation9 + $0x10] sm:$0xff] }
 0x8d5   :  { %v5894_v20 = vld [vmem:[%s7298_s8 + $0x114] ss:$8 sps:$4 sm:$0xff]  }
 0x8d6   :  { %5567 = vmatprep.subr.bf16.mxu1 %v5566_v53 }
 0x8dc   :  { %v4937_v55 = vpop.f32.mrb[22].mxu0 }
 0x8dd   :  { %v4938_v56 = vpop.f32.mrb[23].mxu0 }
 0x8de   :  { %v4939_v57 = vadd.f32 %v4938_v56, %v4937_v55  ;;  %v3994_v55 = vld [vmem:[#allocation9 + $0xa0] sm:$0xff]  ;;  %v3995_v56 = vld [vmem:[#allocation9 + $0xa8] sm:$0xff] }
 0x8e0   :  { %v2986_v40 = vadd.f32 %v4939_v57, %v4904_v23  ;;  %v3977_v23 = vld [vmem:[#allocation9 + $0x18] sm:$0xff] }
 0x8e1   :  { %v5568_v57 = vpack.c.bf16 %v3977_v23, %v3976_v54  ;;  %v5892_v54 = vld [vmem:[%s7298_s8 + $0x110] ss:$8 sps:$4 sm:$0xff]  }
 0x8e3   :  { %5569 = vmatpush3.bf16.msra.mxu1 %v5568_v57 }
 0x8f2   :  { %v3055_v6 = vpop.f32.mrb[32].mxu1 }
 0x8f3   :  { %v3056_v11 = vadd.f32 %v3055_v6, %v2986_v40  ;;  %v5195_v13 = vpop.f32.mrb[33].mxu1  ;;  %v5570_v40 = vpack.c.bf16 %v3995_v56, %v3994_v55  ;;  %v3978_v6 = vld [vmem:[#allocation9 + $0x20] sm:$0xff] }
 0x8f4   :  { %v3996_v13 = vld [vmem:[#allocation9 + $0xb0] sm:$0xff] }
 0x8f5   :  { %v3059_v14 = vmul.f32 0.03846154, %v3056_v11  ;;  %v3979_v11 = vld [vmem:[#allocation9 + $0x28] sm:$0xff]  ;;  %5571 = vmatprep.subr.bf16.mxu1 %v5570_v40  ;;  %v5900_v40 = vld [vmem:[%s7298_s8 + $0x134] ss:$8 sps:$4 sm:$0xff]  }
 0x8f6   :  { %v5897_v55 = vld [vmem:[%s7298_s8 + $0x124] ss:$8 sps:$4 sm:$0xff]  }
 0x8f7   :  { %v3060_v15 = vadd.f32 1e-05, %v3059_v14  ;;  %v3997_v14 = vld [vmem:[#allocation9 + $0xb8] sm:$0xff] }
 0x8f9   :  { %5963 = vrsqrt.f32 %v3060_v15  ;;  %v5572_v15 = vpack.c.bf16 %v3979_v11, %v3978_v6 }
 0x8fb   :  { %5573 = vmatpush3.bf16.msra.mxu1 %v5572_v15 }
 0x903   :  { %v5964_v16 = vpop.eup %5963 }
 0x904   :  { %v3062_v17 = vmul.f32 %v5964_v16, %v107_v7  ;;  %v5574_v7 = vpack.c.bf16 %v3997_v14, %v3996_v13  ;;  %v3980_v16 = vld [vmem:[#allocation9 + $0x30] sm:$0xff] }
 0x906   :  { %4229 = vmatmul.mubr.msk.f32.vlgmr.msra.gmra.mrb[24].mxu0 %vm2568_vm8, %v3062_v17  ;;  %5575 = vmatprep.subr.bf16.mxu1 %v5574_v7  ;;  %v5898_v7 = vld [vmem:[%s7298_s8 + $0x130] ss:$8 sps:$4 sm:$0xff]  }
 0x907   :  { %5551 = vmatpush1.bf16.msra.mxu0 %v6882_v24  ;;  %3201 = vmatprep.mubr.f32.mxu0 %v7314_v26  ;;  %v5843_v24 = vld [vmem:[%s7298_s8 + $0x4] ss:$8 sps:$4 sm:$0xff]  }
 0x908   :  { %5553 = vmatprep.subr.bf16.mxu0 %v6884_v30  ;;  %v5841_v30 = vld [vmem:[%s7298_s8] ss:$8 sps:$4 sm:$0xff]  }
 0x90b   :  { %5555 = vmatpush1.bf16.msra.mxu0 %v6890_v0  ;;  %v5849_v0 = vld [vmem:[%s7298_s8 + $0x24] ss:$8 sps:$4 sm:$0xff]  }
 0x90c   :  { %3145 = vmatprep.subr.mxu0 %v419_v41  ;;  %v5847_v41 = vld [vmem:[%s7298_s8 + $0x20] ss:$8 sps:$4 sm:$0xff]  }
 0x90f   :  { %3146 = vmatpush1.msra.mxu0 %v418_v39  ;;  %v5852_v39 = vld [vmem:[%s7298_s8 + $0x34] ss:$8 sps:$4 sm:$0xff]  }
 0x910   :  { %4230 = vmatmul.mubr.msk.f32.vlgmr.msra.gmra.mrb[26].mxu0 %vm2568_vm8, %v3062_v17  ;;  %5556 = vmatprep.subr.bf16.mxu0 %v7315_v9 }
 0x911   :  { %5558 = vmatpush3.bf16.msra.mxu0 %v6899_v10  ;;  %5206 = vmatprep.mubr.msk.f32.mxu0 %vm6093_vm0, %v7314_v26  ;;  %v5850_v10 = vld [vmem:[%s7298_s8 + $0x30] ss:$8 sps:$4 sm:$0xff]  }
 0x912   :  { %5559 = vmatprep.subr.bf16.mxu0 %v7315_v9  ;;  %v5855_v9 = vld [vmem:[%s7298_s8 + $0x44] ss:$8 sps:$4 sm:$0xff]  }
 0x915   :  { %5561 = vmatpush3.bf16.msra.mxu0 %v6906_v61  ;;  %v5853_v61 = vld [vmem:[%s7298_s8 + $0x40] ss:$8 sps:$4 sm:$0xff]  }
 0x916   :  { %5204 = vmatprep.subr.mxu0 %v7314_v26  ;;  %v5844_v26 = vld [vmem:[%s7298_s8 + $0x10] ss:$8 sps:$4 sm:$0xff]  }
 0x919   :  { %5205 = vmatpush3.msra.mxu0 %v420_v22  ;;  %v5856_v22 = vld [vmem:[%s7298_s8 + $0x50] ss:$8 sps:$4 sm:$0xff]  }
 0x91a   :  { %5207 = vmatmul.mubr.msk.f32.vlgmr.msra.gmra.mrb[28].mxu0 %vm2568_vm8, %v3062_v17  ;;  %3845 = vmatprep.subr.bf16.mxu0 %v5843_v24  ;;  %v3981_v17 = vld [vmem:[#allocation9 + $0x38] sm:$0xff]  ;;  %v3998_v24 = vld [vmem:[#allocation9 + $0xc0] sm:$0xff] }
 0x91b   :  { %3846 = vmatpush1.bf16.msra.mxu0 %v5841_v30  ;;  %v3999_v30 = vld [vmem:[#allocation9 + $0xc8] sm:$0xff] }
 0x91c   :  { %3847 = vmatprep.subr.bf16.mxu0 %v5846_v1  ;;  %v5576_v1 = vpack.c.bf16 %v3981_v17, %v3980_v16  ;;  %v5903_v16 = vld [vmem:[%s7298_s8 + $0x144] ss:$8 sps:$4 sm:$0xff]  }
 0x91e   :  { %5577 = vmatpush3.bf16.msra.mxu1 %v5576_v1  ;;  %v5912_v1 = vld [vmem:[%s7298_s8 + $0x174] ss:$8 sps:$4 sm:$0xff]  }
 0x91f   :  { %3848 = vmatpush1.bf16.msra.mxu0 %v5844_v26  ;;  %v5578_v26 = vpack.c.bf16 %v3999_v30, %v3998_v24  ;;  %v5909_v24 = vld [vmem:[%s7298_s8 + $0x164] ss:$8 sps:$4 sm:$0xff]   ;;  %v5907_v30 = vld [vmem:[%s7298_s8 + $0x160] ss:$8 sps:$4 sm:$0xff]  }
 0x920   :  { %3849 = vmatprep.subr.bf16.mxu0 %v5849_v0  ;;  %v3982_v0 = vld [vmem:[#allocation9 + $0x40] sm:$0xff] }
 0x921   :  { %5579 = vmatprep.subr.bf16.mxu1 %v5578_v26  ;;  %v5910_v26 = vld [vmem:[%s7298_s8 + $0x170] ss:$8 sps:$4 sm:$0xff]  }
 0x923   :  { %3850 = vmatpush1.bf16.msra.mxu0 %v5847_v41  ;;  %v3983_v41 = vld [vmem:[#allocation9 + $0x48] sm:$0xff] }
 0x924   :  { %3851 = vmatprep.subr.bf16.mxu0 %v5852_v39  ;;  %v4000_v39 = vld [vmem:[#allocation9 + $0xd0] sm:$0xff] }
 0x927   :  { %3852 = vmatpush1.bf16.msra.mxu0 %v5850_v10  ;;  %v4001_v10 = vld [vmem:[#allocation9 + $0xd8] sm:$0xff] }
 0x928   :  { %3853 = vmatprep.subr.bf16.mxu0 %v5855_v9  ;;  %v106_v9 = vld [vmem:[#allocation2 + $0xc] sm:$0x1f] }
 0x929   :  { %v3319_v27 = vrot.slane %v106_v9, %v7319_v45  ;;  %v3323_v11 = vrot.slane %v106_v9, %v1447_v44  ;;  %v5906_v44 = vld [vmem:[%s7298_s8 + $0x154] ss:$8 sps:$4 sm:$0xff]   ;;  %v5957_v45 = vld [vmem:[%s7298_s8 + $0x264] ss:$8 sps:$4 sm:$0xff]  }
 0x92b   :  { %3854 = vmatpush1.bf16.msra.mxu0 %v5853_v61  ;;  %v5580_v61 = vpack.c.bf16 %v3983_v41, %v3982_v0  ;;  %v5915_v0 = vld [vmem:[%s7298_s8 + $0x184] ss:$8 sps:$4 sm:$0xff]   ;;  %v5913_v41 = vld [vmem:[%s7298_s8 + $0x180] ss:$8 sps:$4 sm:$0xff]  }
 0x92c   :  { %3855 = vmatprep.subr.bf16.mxu0 %v5858_v12  ;;  %v5582_v12 = vpack.c.bf16 %v4001_v10, %v4000_v39  ;;  %v5918_v39 = vld [vmem:[%s7298_s8 + $0x194] ss:$8 sps:$4 sm:$0xff]   ;;  %v5916_v10 = vld [vmem:[%s7298_s8 + $0x190] ss:$8 sps:$4 sm:$0xff]  }
 0x92d   :  { %5581 = vmatpush3.bf16.msra.mxu1 %v5580_v61  ;;  %v5919_v61 = vld [vmem:[%s7298_s8 + $0x1a0] ss:$8 sps:$4 sm:$0xff]  }
 0x92e   :  { %5583 = vmatprep.subr.bf16.mxu1 %v5582_v12  ;;  %v5924_v12 = vld [vmem:[%s7298_s8 + $0x1b4] ss:$8 sps:$4 sm:$0xff]  }
 0x92f   :  { %3856 = vmatpush1.bf16.msra.mxu0 %v5856_v22  ;;  %v3984_v22 = vld [vmem:[#allocation9 + $0x50] sm:$0xff] }
 0x930   :  { %3857 = vmatprep.subr.bf16.mxu0 %v5861_v18  ;;  %v3985_v18 = vld [vmem:[#allocation9 + $0x58] sm:$0xff] }
 0x933   :  { %3858 = vmatpush1.bf16.msra.mxu0 %v5859_v34 }
 0x934   :  { %3859 = vmatprep.subr.bf16.mxu0 %v5864_v8 }
 0x937   :  { %3860 = vmatpush1.bf16.msra.mxu0 %v5862_v19  ;;  %v3307_v19 = vrot.slane %v106_v9, %v6400_v38 }
 0x938   :  { %3861 = vmatprep.subr.bf16.mxu0 %v5867_v29 }
 0x93b   :  { %3862 = vmatpush1.bf16.msra.mxu0 %v5865_v36 }
 0x93c   :  { %3863 = vmatprep.subr.bf16.mxu0 %v5870_v21  ;;  %v7317_v21 = vld [vmem:[#allocation14_spill] sm:$0xff] }
 0x93f   :  { %3864 = vmatpush1.bf16.msra.mxu0 %v5868_v42  ;;  %v3311_v42 = vrot.slane %v106_v9, %v7317_v21 }
 0x940   :  { %3865 = vmatprep.subr.bf16.mxu0 %v5873_v46  ;;  %v5584_v46 = vpack.c.bf16 %v3985_v18, %v3984_v22  ;;  %v5922_v22 = vld [vmem:[%s7298_s8 + $0x1b0] ss:$8 sps:$4 sm:$0xff]   ;;  %v5927_v18 = vld [vmem:[%s7298_s8 + $0x1c4] ss:$8 sps:$4 sm:$0xff]  }
 0x942   :  { %5585 = vmatpush3.bf16.msra.mxu1 %v5584_v46 }
 0x943   :  { %3866 = vmatpush1.bf16.msra.mxu0 %v5871_v43 }
 0x944   :  { %3867 = vmatprep.subr.bf16.mxu0 %v5876_v33 }
 0x947   :  { %3868 = vmatpush1.bf16.msra.mxu0 %v5874_v35 }
 0x948   :  { %3869 = vmatprep.subr.bf16.mxu0 %v5879_v49 }
 0x94b   :  { %3870 = vmatpush1.bf16.msra.mxu0 %v5877_v60 }
 0x94c   :  { %3871 = vmatprep.subr.bf16.mxu0 %v5882_v62 }
 0x94f   :  { %3872 = vmatpush1.bf16.msra.mxu0 %v5880_v63 }
 0x950   :  { %3873 = vmatprep.subr.bf16.mxu0 %v5885_v2 }
 0x953   :  { %3874 = vmatpush1.bf16.msra.mxu0 %v5883_v4 }
 0x954   :  { %3875 = vmatprep.subr.bf16.mxu0 %v5888_v5 }
 0x957   :  { %3876 = vmatpush1.bf16.msra.mxu0 %v5886_v52  ;;  %v7318_v52 = vld [vmem:[#allocation13_spill] sm:$0xff] }
 0x958   :  { %3886 = vmatprep.subr.bf16.mxu0 %v5891_v25  ;;  %v3315_v25 = vrot.slane %v106_v9, %v7318_v52  ;;  %v5921_v9 = vld [vmem:[%s7298_s8 + $0x1a4] ss:$8 sps:$4 sm:$0xff]   ;;  %v5948_v52 = vld [vmem:[%s7298_s8 + $0x234] ss:$8 sps:$4 sm:$0xff]  }
 0x9d9   :  { %v3132_v34 = vpop.f32.mrb[24].mxu0 }
 0x9da   :  { %v3281_v8 = vrot.slane %v3132_v34, %v6400_v38  ;;  %v3134_v29 = vpop.f32.mrb[25].mxu0  ;;  %v5925_v34 = vld [vmem:[%s7298_s8 + $0x1c0] ss:$8 sps:$4 sm:$0xff]  }
 0x9db   :  { %v3285_v36 = vrot.slane %v3134_v29, %v6400_v38  ;;  %v5933_v29 = vld [vmem:[%s7298_s8 + $0x1e4] ss:$8 sps:$4 sm:$0xff]  }
 0x9dc   :  { %v3298_v43 = vmul.f32 %v3281_v8, %v6939_v47  ;;  %v5889_v47 = vld [vmem:[%s7298_s8 + $0x100] ss:$8 sps:$4 sm:$0xff]   ;;  %v5930_v8 = vld [vmem:[%s7298_s8 + $0x1d4] ss:$8 sps:$4 sm:$0xff]  }
 0x9dd   :  { %v3299_v33 = vmul.f32 %v3285_v36, %v6942_v31  ;;  %v5931_v36 = vld [vmem:[%s7298_s8 + $0x1e0] ss:$8 sps:$4 sm:$0xff]  }
 0x9de   :  { %v3329_v35 = vadd.f32 %v3307_v19, %v3298_v43  ;;  %v5928_v19 = vld [vmem:[%s7298_s8 + $0x1d0] ss:$8 sps:$4 sm:$0xff]  }
 0x9df   :  { %v3330_v49 = vadd.f32 %v3311_v42, %v3299_v33  ;;  %v5936_v42 = vld [vmem:[%s7298_s8 + $0x1f4] ss:$8 sps:$4 sm:$0xff]   ;;  %v5934_v43 = vld [vmem:[%s7298_s8 + $0x1f0] ss:$8 sps:$4 sm:$0xff]   ;;  %v5939_v33 = vld [vmem:[%s7298_s8 + $0x204] ss:$8 sps:$4 sm:$0xff]  }
 0x9e0   :  { %vm3334_vm9 = vcmp.ge.f32.partialorder %v3329_v35, 0.0  ;;  %v3339_v60 = vmul.f32 0.01, %v3329_v35 }
 0x9e1   :  { %vm3335_vm10 = vcmp.ge.f32.partialorder %v3330_v49, 0.0  ;;  %v3340_v62 = vmul.f32 0.01, %v3330_v49 }
 0x9e2   :  { %v3344_v63 = vsel %vm3334_vm9, %v3329_v35, %v3339_v60 }
 0x9e3   :  { %v3203_v2 = vpop.f32.mrb[26].mxu0  ;;  %v3345_v4 = vsel %vm3335_vm10, %v3330_v49, %v3340_v62  ;;  %v3349_v28 = vpack.c.bf16 %v3344_v63, %v3344_v63  ;;  %v5937_v49 = vld [vmem:[%s7298_s8 + $0x200] ss:$8 sps:$4 sm:$0xff]   ;;  %v5942_v62 = vld [vmem:[%s7298_s8 + $0x214] ss:$8 sps:$4 sm:$0xff]  }
 0x9e4   :  { %v3289_v5 = vrot.slane %v3203_v2, %v6400_v38  ;;  %v3205_v32 = vpop.f32.mrb[27].mxu0  ;;  %v3350_v48 = vpack.c.bf16 %v3345_v4, %v3345_v4  ;;  %v5940_v63 = vld [vmem:[%s7298_s8 + $0x210] ss:$8 sps:$4 sm:$0xff]   ;;  %v7320_v2 = vmov 0   ;;  %v5945_v4 = vld [vmem:[%s7298_s8 + $0x224] ss:$8 sps:$4 sm:$0xff]  }
 0x9e5   :  { %v3293_v31 = vrot.slane %v3205_v32, %v6400_v38  ;;  %v5951_v32 = vld [vmem:[%s7298_s8 + $0x244] ss:$8 sps:$4 sm:$0xff]  }
 0x9e6   :  { %v3300_v51 = vmul.f32 %v3289_v5, %v6953_v50  ;;  %3877 = vmatprep.mubr.bf16.mxu0 %v3350_v48  ;;  %v5895_v50 = vld [vmem:[%s7298_s8 + $0x120] ss:$8 sps:$4 sm:$0xff]  }
 0x9e7   :  { %v3301_v3 = vmul.f32 %v3293_v31, %v6956_v58  ;;  %3878 = vmatmul.mubr.bf16.vlgmr.msra.gmra.mrb[32].mxu0 %v3349_v28  ;;  %v5943_v5 = vld [vmem:[%s7298_s8 + $0x220] ss:$8 sps:$4 sm:$0xff]   ;;  %v5952_v31 = vld [vmem:[%s7298_s8 + $0x250] ss:$8 sps:$4 sm:$0xff]   ;;  %v5960_v28 = vld [vmem:[%s7298_s8 + $0x274] ss:$8 sps:$4 sm:$0xff]  }
 0x9e8   :  { %v7135_v53 = vadd.f32 %v3315_v25, %v3300_v51  ;;  %3887 = vmatpush1.bf16.msra.mxu0 %v5889_v47  ;;  %v5946_v25 = vld [vmem:[%s7298_s8 + $0x230] ss:$8 sps:$4 sm:$0xff]   ;;  %v5949_v48 = vld [vmem:[%s7298_s8 + $0x240] ss:$8 sps:$4 sm:$0xff]   ;;  %v5954_v47 = vld [vmem:[%s7298_s8 + $0x254] ss:$8 sps:$4 sm:$0xff]  }
 0x9e9   :  { %v3332_v23 = vadd.f32 %v3319_v27, %v3301_v3  ;;  %3888 = vmatprep.subr.bf16.mxu0 %v5894_v20  ;;  %v5955_v27 = vld [vmem:[%s7298_s8 + $0x260] ss:$8 sps:$4 sm:$0xff]   ;;  %v5958_v51 = vld [vmem:[%s7298_s8 + $0x270] ss:$8 sps:$4 sm:$0xff]  }
 0x9ea   :  { %v3341_v46 = vmul.f32 0.01, %v7135_v53  ;;  %vm3336_vm12 = vcmp.ge.f32.partialorder %v7135_v53, 0.0 }
 0x9eb   :  { %vm3337_vm11 = vcmp.ge.f32.partialorder %v3332_v23, 0.0  ;;  %v3342_v56 = vmul.f32 0.01, %v3332_v23 }
 0x9ec   :  { %3889 = vmatpush1.bf16.msra.mxu0 %v5892_v54  ;;  %v3346_v35 = vsel %vm3336_vm12, %v7135_v53, %v3341_v46  ;;  %v4002_v54 = vld [vmem:[#allocation9 + $0xe0] sm:$0xff] }
 0x9ed   :  { %v3274_v58 = vpop.f32.mrb[28].mxu0  ;;  %3890 = vmatprep.subr.bf16.mxu0 %v5897_v55  ;;  %v3347_v57 = vsel %vm3337_vm11, %v3332_v23, %v3342_v56  ;;  %v3351_v60 = vpack.c.bf16 %v3346_v35, %v3346_v35  ;;  %v4003_v23 = vld [vmem:[#allocation9 + $0xe8] sm:$0xff]  ;;  %v3986_v56 = vld [vmem:[#allocation9 + $0x60] sm:$0xff] }
 0x9ee   :  { %v3297_v6 = vrot.slane %v3274_v58, %v6400_v38  ;;  %v5208_v13 = vpop.f32.mrb[29].mxu0  ;;  %v3352_v14 = vpack.c.bf16 %v3347_v57, %v3347_v57  ;;  %v5586_v55 = vpack.c.bf16 %v4003_v23, %v4002_v54  ;;  %v4004_v57 = vld [vmem:[#allocation9 + $0xf0] sm:$0xff] }
 0x9ef   :  { %v3989_v13 = vld [vmem:[#allocation9 + $0x78] sm:$0xff] }
 0x9f0   :  { %v3302_v15 = vmul.f32 %v3297_v6, %v6966_v59  ;;  %3891 = vmatpush1.bf16.msra.mxu0 %v5895_v50  ;;  %3918 = vmatprep.mubr.bf16.mxu0 %v3352_v14  ;;  %v5904_v59 = vld [vmem:[%s7298_s8 + $0x150] ss:$8 sps:$4 sm:$0xff]   ;;  %v3987_v50 = vld [vmem:[#allocation9 + $0x68] sm:$0xff] }
 0x9f1   :  { %3892 = vmatprep.subr.bf16.mxu0 %v5900_v40  ;;  %v5588_v58 = vpack.c.bf16 %v3987_v50, %v3986_v56  ;;  %5587 = vmatprep.subr.bf16.mxu1 %v5586_v55  ;;  %v4005_v40 = vld [vmem:[#allocation9 + $0xf8] sm:$0xff] }
 0x9f2   :  { %v7159_v17 = vadd.f32 %v3323_v11, %v3302_v15  ;;  %v5590_v6 = vpack.c.bf16 %v4005_v40, %v4004_v57  ;;  %v3988_v11 = vld [vmem:[#allocation9 + $0x70] sm:$0xff] }
 0x9f3   :  { %5589 = vmatpush3.bf16.msra.mxu1 %v5588_v58  ;;  %v5592_v14 = vpack.c.bf16 %v3989_v13, %v3988_v11  ;;  %v108_v15 = vld [vmem:[#allocation2 + $0x12] sm:$0x3] }
 0x9f4   :  { %3893 = vmatpush1.bf16.msra.mxu0 %v5898_v7  ;;  %v3343_v20 = vmul.f32 0.01, %v7159_v17  ;;  %vm3338_vm13 = vcmp.ge.f32.partialorder %v7159_v17, 0.0  ;;  %5591 = vmatprep.subr.bf16.mxu1 %v5590_v6  ;;  %v3438_v7 = vrot.slane %v108_v15, %v6400_v38 }
 0x9f5   :  { %3894 = vmatprep.subr.bf16.mxu0 %v5903_v16  ;;  %v3442_v16 = vrot.slane %v108_v15, %v7317_v21 }
 0x9f6   :  { %v3348_v3 = vsel %vm3338_vm13, %v7159_v17, %v3343_v20 }
 0x9f7   :  { %v3353_v53 = vpack.c.bf16 %v3348_v3, %v3348_v3  ;;  %5593 = vmatpush3.bf16.msra.mxu1 %v5592_v14 }
 0x9f8   :  { %3895 = vmatpush1.bf16.msra.mxu0 %v5901_v37 }
 0x9f9   :  { %3896 = vmatprep.subr.bf16.mxu0 %v5906_v44 }
 0x9fc   :  { %3897 = vmatpush1.bf16.msra.mxu0 %v5904_v59 }
 0x9fd   :  { %3898 = vmatprep.subr.bf16.mxu0 %v5909_v24 }
 0xa00   :  { %3899 = vmatpush1.bf16.msra.mxu0 %v5907_v30 }
 0xa01   :  { %3900 = vmatprep.subr.bf16.mxu0 %v5912_v1 }
 0xa04   :  { %3901 = vmatpush1.bf16.msra.mxu0 %v5910_v26 }
 0xa05   :  { %3902 = vmatprep.subr.bf16.mxu0 %v5915_v0 }
 0xa08   :  { %3903 = vmatpush1.bf16.msra.mxu0 %v5913_v41 }
 0xa09   :  { %3904 = vmatprep.subr.bf16.mxu0 %v5918_v39 }
 0xa0c   :  { %3905 = vmatpush1.bf16.msra.mxu0 %v5916_v10  ;;  %v4312_v10 = vld [vmem:[#allocation2 + $0x14] ss:$0 sm:$0xff] }
 0xa0d   :  { %3906 = vmatprep.subr.bf16.mxu0 %v5921_v9 }
 0xa10   :  { %3907 = vmatpush1.bf16.msra.mxu0 %v5919_v61 }
 0xa11   :  { %3908 = vmatprep.subr.bf16.mxu0 %v5924_v12 }
 0xa14   :  { %3909 = vmatpush1.bf16.msra.mxu0 %v5922_v22 }
 0xa15   :  { %3910 = vmatprep.subr.bf16.mxu0 %v5927_v18 }
 0xa18   :  { %3911 = vmatpush1.bf16.msra.mxu0 %v5925_v34 }
 0xa19   :  { %3912 = vmatprep.subr.bf16.mxu0 %v5930_v8 }
 0xa1c   :  { %3913 = vmatpush1.bf16.msra.mxu0 %v5928_v19 }
 0xa1d   :  { %3914 = vmatprep.subr.bf16.mxu0 %v5933_v29 }
 0xa20   :  { %3915 = vmatpush1.bf16.msra.mxu0 %v5931_v36 }
 0xa21   :  { %3916 = vmatprep.subr.bf16.mxu0 %v5936_v42 }
 0xa24   :  { %3917 = vmatpush1.bf16.msra.mxu0 %v5934_v43 }
 0xa25   :  { %3927 = vmatprep.subr.bf16.mxu0 %v5939_v33 }
 0xa27   :  { %3919 = vmatmul.mubr.bf16.vlgmr.msra.gmra.mrb[32].mxu0 %v3351_v60 }
 0xa28   :  { %3928 = vmatpush1.bf16.msra.mxu0 %v5937_v49  ;;  %3959 = vmatprep.mubr.bf16.mxu0 %v7320_v2 }
 0xa29   :  { %3929 = vmatprep.subr.bf16.mxu0 %v5942_v62 }
 0xa2c   :  { %3930 = vmatpush1.bf16.msra.mxu0 %v5940_v63 }
 0xa2d   :  { %3931 = vmatprep.subr.bf16.mxu0 %v5945_v4 }
 0xa30   :  { %3932 = vmatpush1.bf16.msra.mxu0 %v5943_v5 }
 0xa31   :  { %3933 = vmatprep.subr.bf16.mxu0 %v5948_v52 }
 0xa34   :  { %3934 = vmatpush1.bf16.msra.mxu0 %v5946_v25 }
 0xa35   :  { %3935 = vmatprep.subr.bf16.mxu0 %v5951_v32 }
 0xa38   :  { %3936 = vmatpush1.bf16.msra.mxu0 %v5949_v48 }
 0xa39   :  { %3937 = vmatprep.subr.bf16.mxu0 %v5954_v47 }
 0xa3c   :  { %3938 = vmatpush1.bf16.msra.mxu0 %v5952_v31 }
 0xa3d   :  { %3939 = vmatprep.subr.bf16.mxu0 %v5957_v45 }
 0xa40   :  { %3940 = vmatpush1.bf16.msra.mxu0 %v5955_v27 }
 0xa41   :  { %3941 = vmatprep.subr.bf16.mxu0 %v5960_v28 }
 0xa44   :  { %3942 = vmatpush1.bf16.msra.mxu0 %v5958_v51 }
 0xa47   :  { %3960 = vmatmul.mubr.bf16.vlgmr.msra.gmra.mrb[32].mxu0 %v3353_v53 }
 0xb1a   :  { %v3961_v17 = vpop.f32.mrb[32].mxu0 }
 0xb1b   :  { %v5600_v37 = vadd.f32 %v3961_v17, %v3438_v7  ;;  %v3963_v44 = vpop.f32.mrb[33].mxu0 }
 0xb1c   :  { %v5601_v59 = vadd.f32 %v3963_v44, %v3442_v16  ;;  %v3965_v24 = vpop.f32.mrb[34].mxu0 }
 0xb1d   :  { %v3970_v30 = vmul.f32 0.01, %v5600_v37  ;;  %v3966_v1 = vpop.f32.mrb[35].mxu0  ;;  %vm3968_vm14 = vcmp.ge.f32.partialorder %v5600_v37, 0.0 }
 0xb1e   :  { %v3971_v26 = vmul.f32 0.01, %v5601_v59  ;;  %vm3969_vm15 = vcmp.ge.f32.partialorder %v5601_v59, 0.0 }
 0xb1f   :  { %v3972_v41 = vsel %vm3968_vm14, %v5600_v37, %v3970_v30 }
 0xb20   :  { %v3973_v0 = vsel %vm3969_vm15, %v5601_v59, %v3971_v26 }
 0xb21   :  { %4076 = vmatprep.mubr.f32.mxu1 %v3973_v0 }
 0xb22   :  { %4077 = vmatmul.mubr.f32.vlgmr.msra.gmra.mrb[34].mxu1 %v3972_v41 }
 0xbf5   :  { %v4995_v39 = vpop.f32.mrb[34].mxu1 }
 0xbf6   :  { %v4996_v9 = vpop.f32.mrb[35].mxu1 }
 0xbf7   :  { %v4997_v38 = vadd.f32 %v4996_v9, %v4995_v39 }
 0xbf9   :  { %v4079_v61 = vadd.f32 %v4997_v38, %v4312_v10 }
 0xbfb   :  { %vm4082_vm0 = vcmp.ge.f32.partialorder %v4079_v61, 0.0  ;;  %v4083_v21 = vmul.f32 0.01, %v4079_v61 }
 0xbfd   :  { %v4084_v12 = vsel %vm4082_vm0, %v4079_v61, %v4083_v21 }
 0xbfe   :  { %4085 = vst [vmem:[%s7300_s10] sm:$0xff] %v4084_v12 }
 0xbff   :  { %4090 = vsyncpa [#allocation3], 1 }
 0xc00   :  { %4091 = vsyncpa [#allocation5], 1 }
 0xc01   :  { %4092 = vsyncpa [#allocation8], 1 }

</bundles_post_ra>
